<compile_context>
chip_gen: v5e
topology: v5e:2x2
jax: 0.10.0
libtpu: 0.0.40
codegen_flags: <defaults>
</compile_context>

<pallas_src>
import functools

import jax
import jax.numpy as jnp
from jax.experimental import pallas as pl
from jax.experimental.pallas import tpu as pltpu


def _down_conv_kernel(x_even_ref, x_odd_ref, w_ref, scale_ref, shift_ref,
                      o_ref, p0_ref, p1_ref, *, negative_slope):
    """One batch block per grid step.

    x_even_ref: (bb, Ho, Wo, 2*Cin)  input rows 2*i   (W phase folded into C)
    x_odd_ref : (bb, Ho, Wo, 2*Cin)  input rows 2*i+1
    w_ref     : (12, 2*Cin, Cout)    effective weight, index (py*2+ky)*3 + t
    scale_ref : (1, Cout)            folded BN scale (gamma / sqrt(var+eps))
    shift_ref : (1, Cout)            folded conv-bias + BN shift
    o_ref     : (bb, Ho, Wo, Cout)
    p0_ref    : (bb, Ho+1, Wo+2, 2*Cin)  VMEM scratch, zero-padded even rows
    p1_ref    : (bb, Ho+1, Wo+2, 2*Cin)  VMEM scratch, zero-padded odd rows
    """
    bb, Ho, Wo, _ = x_even_ref.shape
    cout = w_ref.shape[-1]

    # In-kernel halo: zero the scratch, then drop the data into the interior.
    #   p0 row r holds input row 2*r      (extra zero row at the bottom),
    #   p1 row r holds input row 2*r - 1  (extra zero row at the top),
    #   both have one zero W-pair column on the left and right.
    zeros = jnp.zeros(p0_ref.shape, p0_ref.dtype)
    p0_ref[...] = zeros
    p1_ref[...] = zeros
    p0_ref[:, 0:Ho, 1:Wo + 1, :] = x_even_ref[...]
    p1_ref[:, 1:Ho + 1, 1:Wo + 1, :] = x_odd_ref[...]

    # Row-block the f32 accumulator (keep it <= ~128 KiB so it does not spill
    # vregs on v5e/v6e).  For the small demo shapes rb == Ho (single pass).
    max_acc_elems = 32 * 1024
    rb = 1
    for d in range(Ho, 0, -1):
        if Ho % d == 0 and bb * d * Wo * cout <= max_acc_elems:
            rb = d
            break

    for r0 in range(0, Ho, rb):
        acc = jnp.zeros((bb * rb, Wo, cout), jnp.float32)
        # 12 taps: 2 H-phases x 2 row offsets x 3 W-pair offsets, each a
        # contiguous-slice bf16 matmul with K = 2*Cin accumulated in f32.
        for py, p_ref in ((0, p0_ref), (1, p1_ref)):
            for ky in range(2):          # row tap within the phase
                for t in range(3):       # W-pair tap
                    patch = p_ref[:, r0 + ky:r0 + ky + rb, t:t + Wo, :]
                    patch = patch.reshape(bb * rb, Wo, patch.shape[-1])
                    acc = acc + jnp.dot(patch, w_ref[(py * 2 + ky) * 3 + t],
                                        preferred_element_type=jnp.float32)
        y = acc * scale_ref[...] + shift_ref[...]        # conv bias + BN (eval)
        y = jnp.where(y >= 0, y, negative_slope * y)     # LeakyReLU
        o_ref[:, r0:r0 + rb, :, :] = y.reshape(bb, rb, Wo, cout).astype(o_ref.dtype)


def _effective_weight(weight_oihw):
    """(Cout, Cin, 4, 4) OIHW -> (12, 2*Cin, Cout) phase-folded weight.

    Flat index = (py*2 + ky)*3 + t with
      py: H phase of the input row (0 = even, 1 = odd),
      ky: row-tap offset inside the padded phase scratch,
      t : W-pair tap offset inside the padded phase scratch,
    and the 2*Cin contraction axis ordered as (px, ci) with px the W phase.
    Taps that fall outside the 4x4 kernel keep zero weights.
    """
    cout, cin, kh, kw = weight_oihw.shape
    assert (kh, kw) == (4, 4), "Down_Conv uses a 4x4 kernel"
    w_hwio = jnp.transpose(weight_oihw, (2, 3, 1, 0)).astype(jnp.float32)
    w_eff = jnp.zeros((2, 2, 3, 2 * cin, cout), jnp.float32)
    for py in range(2):
        for ky in range(2):
            dy = 2 * ky + (1 - py)
            for t in range(3):
                for px in range(2):
                    dx = 2 * t + px - 1
                    if 0 <= dx < 4:
                        w_eff = w_eff.at[py, ky, t,
                                         px * cin:(px + 1) * cin, :].set(w_hwio[dy, dx])
    return w_eff.reshape(12, 2 * cin, cout)


def _pick_batch_block(batch, per_elem_bytes, budget_bytes=2 << 20):
    # Keep >= 2 grid steps when batch >= 2 (so megacore / v7x's two
    # TensorCores both get work), otherwise block as many batch elements
    # per step as the VMEM budget allows.
    cap = batch if batch == 1 else batch // 2
    cap = max(1, min(cap, budget_bytes // max(per_elem_bytes, 1)))
    bb = 1
    for d in range(1, batch + 1):
        if batch % d == 0 and d <= cap:
            bb = d
    return bb


def down_conv(x_nchw, weight_oihw, bias, gamma, beta, running_mean, running_var,
              *, eps=1e-5, negative_slope=0.01, compute_dtype=jnp.bfloat16,
              batch_block=None):
    """Inference Down_Conv: Conv2d(k=4, s=2, p=1) + BatchNorm2d(eval) + LeakyReLU.

    x_nchw:      (B, Cin, H, W)     raw PyTorch layout, H and W even.
    weight_oihw: (Cout, Cin, 4, 4)  raw PyTorch Conv2d weight.
    Returns (B, Cout, H//2, W//2) NCHW, dtype of x_nchw.
    """
    B, Cin, H, W = x_nchw.shape
    Cout = weight_oihw.shape[0]
    assert weight_oihw.shape == (Cout, Cin, 4, 4)
    assert H % 2 == 0 and W % 2 == 0, "H and W must be even (stride-2 conv)"
    Ho, Wo = H // 2, W // 2

    # NCHW -> NHWC plumbing (once), bf16 compute dtype, then a *free* (bitcast)
    # reshape: split H into (Ho, 2) phases and fold the W phase into channels.
    x_nhwc = jnp.transpose(x_nchw, (0, 2, 3, 1)).astype(compute_dtype)
    x5 = x_nhwc.reshape(B, Ho, 2, Wo, 2 * Cin)

    w_eff = _effective_weight(weight_oihw).astype(compute_dtype)

    # Fold conv bias + eval-mode BatchNorm into one per-channel scale/shift.
    f32 = jnp.float32
    inv_std = gamma.astype(f32) / jnp.sqrt(running_var.astype(f32) + eps)
    scale = inv_std.reshape(1, Cout)
    shift = ((bias.astype(f32) - running_mean.astype(f32)) * inv_std
             + beta.astype(f32)).reshape(1, Cout)

    if batch_block is None:
        cbytes = jnp.dtype(compute_dtype).itemsize
        obytes = jnp.dtype(x_nchw.dtype).itemsize
        per_elem = (2 * H * W * Cin * cbytes                      # input (2-buf)
                    + 2 * Ho * Wo * Cout * obytes                 # output (2-buf)
                    + 2 * (Ho + 1) * (Wo + 2) * 2 * Cin * cbytes)  # halo scratch
        batch_block = _pick_batch_block(B, per_elem)
    bb = batch_block
    assert B % bb == 0, "batch_block must divide the batch size"

    grid_spec = pltpu.PrefetchScalarGridSpec(
        num_scalar_prefetch=0,
        grid=(B // bb,),
        in_specs=[
            # Even / odd input rows of the *same* HBM array: the BlockSpec DMA
            # de-interleaves the H phases; no extra XLA pass, no stride-2
            # gathers inside the kernel.
            pl.BlockSpec((bb, Ho, None, Wo, 2 * Cin), lambda b: (b, 0, 0, 0, 0)),
            pl.BlockSpec((bb, Ho, None, Wo, 2 * Cin), lambda b: (b, 0, 1, 0, 0)),
            pl.BlockSpec((12, 2 * Cin, Cout), lambda b: (0, 0, 0)),
            pl.BlockSpec((1, Cout), lambda b: (0, 0)),
            pl.BlockSpec((1, Cout), lambda b: (0, 0)),
        ],
        out_specs=pl.BlockSpec((bb, Ho, Wo, Cout), lambda b: (b, 0, 0, 0)),
        scratch_shapes=[pltpu.VMEM((bb, Ho + 1, Wo + 2, 2 * Cin), compute_dtype)] * 2,
    )

    out_nhwc = pl.pallas_call(
        functools.partial(_down_conv_kernel, negative_slope=negative_slope),
        out_shape=jax.ShapeDtypeStruct((B, Ho, Wo, Cout), x_nchw.dtype),
        grid_spec=grid_spec,
        compiler_params=pltpu.CompilerParams(dimension_semantics=("parallel",)),
    )(x5, x5, w_eff, scale, shift)

    return jnp.transpose(out_nhwc, (0, 3, 1, 2))          # back to NCHW


def _reference(x_nchw, weight_oihw, bias, gamma, beta, mean, var,
               *, eps=1e-5, negative_slope=0.01, compute_dtype=jnp.bfloat16):
    """Pure-JAX reference with the same bf16-in / f32-accumulate numerics."""
    x = jnp.transpose(x_nchw, (0, 2, 3, 1)).astype(compute_dtype)
    w = jnp.transpose(weight_oihw, (2, 3, 1, 0)).astype(compute_dtype)
    y = jax.lax.conv_general_dilated(
        x, w, window_strides=(2, 2), padding=((1, 1), (1, 1)),
        dimension_numbers=("NHWC", "HWIO", "NHWC"),
        preferred_element_type=jnp.float32)
    y = y + bias.astype(jnp.float32)
    y = (y - mean) / jnp.sqrt(var + eps) * gamma + beta
    y = jnp.where(y >= 0, y, negative_slope * y)
    return jnp.transpose(y, (0, 3, 1, 2)).astype(x_nchw.dtype)


if __name__ == "__main__":
    # Small shapes consistent with the module: x is NCHW (B, in_c, H, W).
    B, in_c, out_c, H, W = 2, 4, 8, 16, 16
    key = jax.random.PRNGKey(0)
    kx, kw, kb, kg, kbe, km, kv = jax.random.split(key, 7)

    x = jax.random.normal(kx, (B, in_c, H, W), dtype=jnp.float32)                 # NCHW
    weight = jax.random.normal(kw, (out_c, in_c, 4, 4), dtype=jnp.float32) * 0.1  # OIHW
    bias = jax.random.normal(kb, (out_c,), dtype=jnp.float32) * 0.1

    # Eval-mode BatchNorm with non-trivial running statistics.
    gamma = 1.0 + 0.1 * jax.random.normal(kg, (out_c,), dtype=jnp.float32)
    beta = 0.1 * jax.random.normal(kbe, (out_c,), dtype=jnp.float32)
    running_mean = 0.1 * jax.random.normal(km, (out_c,), dtype=jnp.float32)
    running_var = 1.0 + 0.1 * jax.random.uniform(kv, (out_c,), dtype=jnp.float32)

    out = down_conv(x, weight, bias, gamma, beta, running_mean, running_var)
    out = jax.block_until_ready(out)

    ref = _reference(x, weight, bias, gamma, beta, running_mean, running_var)
    assert out.shape == (B, out_c, H // 2, W // 2), out.shape
    assert jnp.allclose(out, ref, atol=1e-2, rtol=1e-2), (
        "mismatch vs reference, max abs err = "
        + str(float(jnp.max(jnp.abs(out - ref)))))

    print("KERNEL_OK")
</pallas_src>

<mosaic_0001>
module attributes {stable_mosaic.version = 11 : i64} {
  func.func @_down_conv_kernel(%arg0: i32, %arg1: memref<1x8x1x8x8xbf16, #tpu.memory_space<vmem>>, %arg2: memref<1x8x1x8x8xbf16, #tpu.memory_space<vmem>>, %arg3: memref<12x8x8xbf16, #tpu.memory_space<vmem>>, %arg4: memref<1x8xf32, #tpu.memory_space<vmem>>, %arg5: memref<1x8xf32, #tpu.memory_space<vmem>>, %arg6: memref<1x8x8x8xf32, #tpu.memory_space<vmem>>, %arg7: memref<1x9x10x8xbf16, #tpu.memory_space<vmem>>, %arg8: memref<1x9x10x8xbf16, #tpu.memory_space<vmem>>) attributes {dimension_semantics = [#tpu.dimension_semantics<parallel>], iteration_bounds = array<i64: 2>, scalar_prefetch = 0 : i64, scratch_operands = 2 : i64, tpu.core_type = #tpu.core_type<tc>, window_params = [{transform_indices = @transform_0, window_bounds = array<i64: 1, 8, 1, 8, 8>}, {transform_indices = @transform_1, window_bounds = array<i64: 1, 8, 1, 8, 8>}, {pipeline_mode = #tpu.pipeline_mode<synchronous>, transform_indices = @transform_2, window_bounds = array<i64: 12, 8, 8>}, {pipeline_mode = #tpu.pipeline_mode<synchronous>, transform_indices = @transform_3, window_bounds = array<i64: 1, 8>}, {pipeline_mode = #tpu.pipeline_mode<synchronous>, transform_indices = @transform_4, window_bounds = array<i64: 1, 8>}, {transform_indices = @transform_5, window_bounds = array<i64: 1, 8, 8, 8>}]} {
    %cst = arith.constant 0.000000e+00 : bf16
    %0 = vector.broadcast %cst : bf16 to vector<1x9x10x8xbf16>
    %c0 = arith.constant 0 : index
    %c0_0 = arith.constant 0 : index
    %c0_1 = arith.constant 0 : index
    %c0_2 = arith.constant 0 : index
    %1 = vector.load %arg7[%c0, %c0_0, %c0_1, %c0_2] : memref<1x9x10x8xbf16, #tpu.memory_space<vmem>>, vector<1x9x10x8xbf16>
    tpu.vector_store %arg7[%c0, %c0_0, %c0_1, %c0_2], %0 {strides = array<i32>} : memref<1x9x10x8xbf16, #tpu.memory_space<vmem>>, vector<1x9x10x8xbf16>,
    %c0_3 = arith.constant 0 : index
    %c0_4 = arith.constant 0 : index
    %c0_5 = arith.constant 0 : index
    %c0_6 = arith.constant 0 : index
    %2 = vector.load %arg8[%c0_3, %c0_4, %c0_5, %c0_6] : memref<1x9x10x8xbf16, #tpu.memory_space<vmem>>, vector<1x9x10x8xbf16>
    tpu.vector_store %arg8[%c0_3, %c0_4, %c0_5, %c0_6], %0 {strides = array<i32>} : memref<1x9x10x8xbf16, #tpu.memory_space<vmem>>, vector<1x9x10x8xbf16>,
    %c0_7 = arith.constant 0 : index
    %c0_8 = arith.constant 0 : index
    %c0_9 = arith.constant 0 : index
    %c0_10 = arith.constant 0 : index
    %c0_11 = arith.constant 0 : index
    %3 = vector.load %arg1[%c0_7, %c0_8, %c0_9, %c0_10, %c0_11] : memref<1x8x1x8x8xbf16, #tpu.memory_space<vmem>>, vector<1x8x1x8x8xbf16>
    %4 = vector.shape_cast %3 : vector<1x8x1x8x8xbf16> to vector<1x8x8x8xbf16>
    %c0_12 = arith.constant 0 : index
    %c0_13 = arith.constant 0 : index
    %c1 = arith.constant 1 : index
    %c0_14 = arith.constant 0 : index
    %5 = vector.load %arg7[%c0_12, %c0_13, %c1, %c0_14] : memref<1x9x10x8xbf16, #tpu.memory_space<vmem>>, vector<1x8x8x8xbf16>
    tpu.vector_store %arg7[%c0_12, %c0_13, %c1, %c0_14], %4 {strides = array<i32>} : memref<1x9x10x8xbf16, #tpu.memory_space<vmem>>, vector<1x8x8x8xbf16>,
    %c0_15 = arith.constant 0 : index
    %c0_16 = arith.constant 0 : index
    %c0_17 = arith.constant 0 : index
    %c0_18 = arith.constant 0 : index
    %c0_19 = arith.constant 0 : index
    %6 = vector.load %arg2[%c0_15, %c0_16, %c0_17, %c0_18, %c0_19] : memref<1x8x1x8x8xbf16, #tpu.memory_space<vmem>>, vector<1x8x1x8x8xbf16>
    %7 = vector.shape_cast %6 : vector<1x8x1x8x8xbf16> to vector<1x8x8x8xbf16>
    %c0_20 = arith.constant 0 : index
    %c1_21 = arith.constant 1 : index
    %c1_22 = arith.constant 1 : index
    %c0_23 = arith.constant 0 : index
    %8 = vector.load %arg8[%c0_20, %c1_21, %c1_22, %c0_23] : memref<1x9x10x8xbf16, #tpu.memory_space<vmem>>, vector<1x8x8x8xbf16>
    tpu.vector_store %arg8[%c0_20, %c1_21, %c1_22, %c0_23], %7 {strides = array<i32>} : memref<1x9x10x8xbf16, #tpu.memory_space<vmem>>, vector<1x8x8x8xbf16>,
    %cst_24 = arith.constant 0.000000e+00 : f32
    %9 = vector.broadcast %cst_24 : f32 to vector<8x8x8xf32>
    %c0_25 = arith.constant 0 : index
    %c0_26 = arith.constant 0 : index
    %c0_27 = arith.constant 0 : index
    %c0_28 = arith.constant 0 : index
    %10 = vector.load %arg7[%c0_25, %c0_26, %c0_27, %c0_28] : memref<1x9x10x8xbf16, #tpu.memory_space<vmem>>, vector<1x8x8x8xbf16>
    %11 = vector.shape_cast %10 : vector<1x8x8x8xbf16> to vector<8x8x8xbf16>
    %c0_29 = arith.constant 0 : index
    %c0_30 = arith.constant 0 : index
    %c0_31 = arith.constant 0 : index
    %12 = vector.load %arg3[%c0_29, %c0_30, %c0_31] : memref<12x8x8xbf16, #tpu.memory_space<vmem>>, vector<1x8x8xbf16>
    %13 = vector.shape_cast %12 : vector<1x8x8xbf16> to vector<8x8xbf16>
    %cst_32 = arith.constant dense<0.000000e+00> : vector<8x8x8xf32>
    %14 = tpu.matmul %11, %13, %cst_32 {dimension_numbers = #tpu.dot_dimension_numbers<[2], [0], [0, 1], [1], [0, 0, 0, 1, 1, 1], [], []>} : vector<8x8x8xbf16>, vector<8x8xbf16>, vector<8x8x8xf32> -> vector<8x8x8xf32>
    %15 = arith.addf %9, %14 : vector<8x8x8xf32>
    %c0_33 = arith.constant 0 : index
    %c0_34 = arith.constant 0 : index
    %c1_35 = arith.constant 1 : index
    %c0_36 = arith.constant 0 : index
    %16 = vector.load %arg7[%c0_33, %c0_34, %c1_35, %c0_36] : memref<1x9x10x8xbf16, #tpu.memory_space<vmem>>, vector<1x8x8x8xbf16>
    %17 = vector.shape_cast %16 : vector<1x8x8x8xbf16> to vector<8x8x8xbf16>
    %c1_37 = arith.constant 1 : index
    %c0_38 = arith.constant 0 : index
    %c0_39 = arith.constant 0 : index
    %18 = vector.load %arg3[%c1_37, %c0_38, %c0_39] : memref<12x8x8xbf16, #tpu.memory_space<vmem>>, vector<1x8x8xbf16>
    %19 = vector.shape_cast %18 : vector<1x8x8xbf16> to vector<8x8xbf16>
    %cst_40 = arith.constant dense<0.000000e+00> : vector<8x8x8xf32>
    %20 = tpu.matmul %17, %19, %cst_40 {dimension_numbers = #tpu.dot_dimension_numbers<[2], [0], [0, 1], [1], [0, 0, 0, 1, 1, 1], [], []>} : vector<8x8x8xbf16>, vector<8x8xbf16>, vector<8x8x8xf32> -> vector<8x8x8xf32>
    %21 = arith.addf %15, %20 : vector<8x8x8xf32>
    %c0_41 = arith.constant 0 : index
    %c0_42 = arith.constant 0 : index
    %c2 = arith.constant 2 : index
    %c0_43 = arith.constant 0 : index
    %22 = vector.load %arg7[%c0_41, %c0_42, %c2, %c0_43] : memref<1x9x10x8xbf16, #tpu.memory_space<vmem>>, vector<1x8x8x8xbf16>
    %23 = vector.shape_cast %22 : vector<1x8x8x8xbf16> to vector<8x8x8xbf16>
    %c2_44 = arith.constant 2 : index
    %c0_45 = arith.constant 0 : index
    %c0_46 = arith.constant 0 : index
    %24 = vector.load %arg3[%c2_44, %c0_45, %c0_46] : memref<12x8x8xbf16, #tpu.memory_space<vmem>>, vector<1x8x8xbf16>
    %25 = vector.shape_cast %24 : vector<1x8x8xbf16> to vector<8x8xbf16>
    %cst_47 = arith.constant dense<0.000000e+00> : vector<8x8x8xf32>
    %26 = tpu.matmul %23, %25, %cst_47 {dimension_numbers = #tpu.dot_dimension_numbers<[2], [0], [0, 1], [1], [0, 0, 0, 1, 1, 1], [], []>} : vector<8x8x8xbf16>, vector<8x8xbf16>, vector<8x8x8xf32> -> vector<8x8x8xf32>
    %27 = arith.addf %21, %26 : vector<8x8x8xf32>
    %c0_48 = arith.constant 0 : index
    %c1_49 = arith.constant 1 : index
    %c0_50 = arith.constant 0 : index
    %c0_51 = arith.constant 0 : index
    %28 = vector.load %arg7[%c0_48, %c1_49, %c0_50, %c0_51] : memref<1x9x10x8xbf16, #tpu.memory_space<vmem>>, vector<1x8x8x8xbf16>
    %29 = vector.shape_cast %28 : vector<1x8x8x8xbf16> to vector<8x8x8xbf16>
    %c3 = arith.constant 3 : index
    %c0_52 = arith.constant 0 : index
    %c0_53 = arith.constant 0 : index
    %30 = vector.load %arg3[%c3, %c0_52, %c0_53] : memref<12x8x8xbf16, #tpu.memory_space<vmem>>, vector<1x8x8xbf16>
    %31 = vector.shape_cast %30 : vector<1x8x8xbf16> to vector<8x8xbf16>
    %cst_54 = arith.constant dense<0.000000e+00> : vector<8x8x8xf32>
    %32 = tpu.matmul %29, %31, %cst_54 {dimension_numbers = #tpu.dot_dimension_numbers<[2], [0], [0, 1], [1], [0, 0, 0, 1, 1, 1], [], []>} : vector<8x8x8xbf16>, vector<8x8xbf16>, vector<8x8x8xf32> -> vector<8x8x8xf32>
    %33 = arith.addf %27, %32 : vector<8x8x8xf32>
    %c0_55 = arith.constant 0 : index
    %c1_56 = arith.constant 1 : index
    %c1_57 = arith.constant 1 : index
    %c0_58 = arith.constant 0 : index
    %34 = vector.load %arg7[%c0_55, %c1_56, %c1_57, %c0_58] : memref<1x9x10x8xbf16, #tpu.memory_space<vmem>>, vector<1x8x8x8xbf16>
    %35 = vector.shape_cast %34 : vector<1x8x8x8xbf16> to vector<8x8x8xbf16>
    %c4 = arith.constant 4 : index
    %c0_59 = arith.constant 0 : index
    %c0_60 = arith.constant 0 : index
    %36 = vector.load %arg3[%c4, %c0_59, %c0_60] : memref<12x8x8xbf16, #tpu.memory_space<vmem>>, vector<1x8x8xbf16>
    %37 = vector.shape_cast %36 : vector<1x8x8xbf16> to vector<8x8xbf16>
    %cst_61 = arith.constant dense<0.000000e+00> : vector<8x8x8xf32>
    %38 = tpu.matmul %35, %37, %cst_61 {dimension_numbers = #tpu.dot_dimension_numbers<[2], [0], [0, 1], [1], [0, 0, 0, 1, 1, 1], [], []>} : vector<8x8x8xbf16>, vector<8x8xbf16>, vector<8x8x8xf32> -> vector<8x8x8xf32>
    %39 = arith.addf %33, %38 : vector<8x8x8xf32>
    %c0_62 = arith.constant 0 : index
    %c1_63 = arith.constant 1 : index
    %c2_64 = arith.constant 2 : index
    %c0_65 = arith.constant 0 : index
    %40 = vector.load %arg7[%c0_62, %c1_63, %c2_64, %c0_65] : memref<1x9x10x8xbf16, #tpu.memory_space<vmem>>, vector<1x8x8x8xbf16>
    %41 = vector.shape_cast %40 : vector<1x8x8x8xbf16> to vector<8x8x8xbf16>
    %c5 = arith.constant 5 : index
    %c0_66 = arith.constant 0 : index
    %c0_67 = arith.constant 0 : index
    %42 = vector.load %arg3[%c5, %c0_66, %c0_67] : memref<12x8x8xbf16, #tpu.memory_space<vmem>>, vector<1x8x8xbf16>
    %43 = vector.shape_cast %42 : vector<1x8x8xbf16> to vector<8x8xbf16>
    %cst_68 = arith.constant dense<0.000000e+00> : vector<8x8x8xf32>
    %44 = tpu.matmul %41, %43, %cst_68 {dimension_numbers = #tpu.dot_dimension_numbers<[2], [0], [0, 1], [1], [0, 0, 0, 1, 1, 1], [], []>} : vector<8x8x8xbf16>, vector<8x8xbf16>, vector<8x8x8xf32> -> vector<8x8x8xf32>
    %45 = arith.addf %39, %44 : vector<8x8x8xf32>
    %c0_69 = arith.constant 0 : index
    %c0_70 = arith.constant 0 : index
    %c0_71 = arith.constant 0 : index
    %c0_72 = arith.constant 0 : index
    %46 = vector.load %arg8[%c0_69, %c0_70, %c0_71, %c0_72] : memref<1x9x10x8xbf16, #tpu.memory_space<vmem>>, vector<1x8x8x8xbf16>
    %47 = vector.shape_cast %46 : vector<1x8x8x8xbf16> to vector<8x8x8xbf16>
    %c6 = arith.constant 6 : index
    %c0_73 = arith.constant 0 : index
    %c0_74 = arith.constant 0 : index
    %48 = vector.load %arg3[%c6, %c0_73, %c0_74] : memref<12x8x8xbf16, #tpu.memory_space<vmem>>, vector<1x8x8xbf16>
    %49 = vector.shape_cast %48 : vector<1x8x8xbf16> to vector<8x8xbf16>
    %cst_75 = arith.constant dense<0.000000e+00> : vector<8x8x8xf32>
    %50 = tpu.matmul %47, %49, %cst_75 {dimension_numbers = #tpu.dot_dimension_numbers<[2], [0], [0, 1], [1], [0, 0, 0, 1, 1, 1], [], []>} : vector<8x8x8xbf16>, vector<8x8xbf16>, vector<8x8x8xf32> -> vector<8x8x8xf32>
    %51 = arith.addf %45, %50 : vector<8x8x8xf32>
    %c0_76 = arith.constant 0 : index
    %c0_77 = arith.constant 0 : index
    %c1_78 = arith.constant 1 : index
    %c0_79 = arith.constant 0 : index
    %52 = vector.load %arg8[%c0_76, %c0_77, %c1_78, %c0_79] : memref<1x9x10x8xbf16, #tpu.memory_space<vmem>>, vector<1x8x8x8xbf16>
    %53 = vector.shape_cast %52 : vector<1x8x8x8xbf16> to vector<8x8x8xbf16>
    %c7 = arith.constant 7 : index
    %c0_80 = arith.constant 0 : index
    %c0_81 = arith.constant 0 : index
    %54 = vector.load %arg3[%c7, %c0_80, %c0_81] : memref<12x8x8xbf16, #tpu.memory_space<vmem>>, vector<1x8x8xbf16>
    %55 = vector.shape_cast %54 : vector<1x8x8xbf16> to vector<8x8xbf16>
    %cst_82 = arith.constant dense<0.000000e+00> : vector<8x8x8xf32>
    %56 = tpu.matmul %53, %55, %cst_82 {dimension_numbers = #tpu.dot_dimension_numbers<[2], [0], [0, 1], [1], [0, 0, 0, 1, 1, 1], [], []>} : vector<8x8x8xbf16>, vector<8x8xbf16>, vector<8x8x8xf32> -> vector<8x8x8xf32>
    %57 = arith.addf %51, %56 : vector<8x8x8xf32>
    %c0_83 = arith.constant 0 : index
    %c0_84 = arith.constant 0 : index
    %c2_85 = arith.constant 2 : index
    %c0_86 = arith.constant 0 : index
    %58 = vector.load %arg8[%c0_83, %c0_84, %c2_85, %c0_86] : memref<1x9x10x8xbf16, #tpu.memory_space<vmem>>, vector<1x8x8x8xbf16>
    %59 = vector.shape_cast %58 : vector<1x8x8x8xbf16> to vector<8x8x8xbf16>
    %c8 = arith.constant 8 : index
    %c0_87 = arith.constant 0 : index
    %c0_88 = arith.constant 0 : index
    %60 = vector.load %arg3[%c8, %c0_87, %c0_88] : memref<12x8x8xbf16, #tpu.memory_space<vmem>>, vector<1x8x8xbf16>
    %61 = vector.shape_cast %60 : vector<1x8x8xbf16> to vector<8x8xbf16>
    %cst_89 = arith.constant dense<0.000000e+00> : vector<8x8x8xf32>
    %62 = tpu.matmul %59, %61, %cst_89 {dimension_numbers = #tpu.dot_dimension_numbers<[2], [0], [0, 1], [1], [0, 0, 0, 1, 1, 1], [], []>} : vector<8x8x8xbf16>, vector<8x8xbf16>, vector<8x8x8xf32> -> vector<8x8x8xf32>
    %63 = arith.addf %57, %62 : vector<8x8x8xf32>
    %c0_90 = arith.constant 0 : index
    %c1_91 = arith.constant 1 : index
    %c0_92 = arith.constant 0 : index
    %c0_93 = arith.constant 0 : index
    %64 = vector.load %arg8[%c0_90, %c1_91, %c0_92, %c0_93] : memref<1x9x10x8xbf16, #tpu.memory_space<vmem>>, vector<1x8x8x8xbf16>
    %65 = vector.shape_cast %64 : vector<1x8x8x8xbf16> to vector<8x8x8xbf16>
    %c9 = arith.constant 9 : index
    %c0_94 = arith.constant 0 : index
    %c0_95 = arith.constant 0 : index
    %66 = vector.load %arg3[%c9, %c0_94, %c0_95] : memref<12x8x8xbf16, #tpu.memory_space<vmem>>, vector<1x8x8xbf16>
    %67 = vector.shape_cast %66 : vector<1x8x8xbf16> to vector<8x8xbf16>
    %cst_96 = arith.constant dense<0.000000e+00> : vector<8x8x8xf32>
    %68 = tpu.matmul %65, %67, %cst_96 {dimension_numbers = #tpu.dot_dimension_numbers<[2], [0], [0, 1], [1], [0, 0, 0, 1, 1, 1], [], []>} : vector<8x8x8xbf16>, vector<8x8xbf16>, vector<8x8x8xf32> -> vector<8x8x8xf32>
    %69 = arith.addf %63, %68 : vector<8x8x8xf32>
    %c0_97 = arith.constant 0 : index
    %c1_98 = arith.constant 1 : index
    %c1_99 = arith.constant 1 : index
    %c0_100 = arith.constant 0 : index
    %70 = vector.load %arg8[%c0_97, %c1_98, %c1_99, %c0_100] : memref<1x9x10x8xbf16, #tpu.memory_space<vmem>>, vector<1x8x8x8xbf16>
    %71 = vector.shape_cast %70 : vector<1x8x8x8xbf16> to vector<8x8x8xbf16>
    %c10 = arith.constant 10 : index
    %c0_101 = arith.constant 0 : index
    %c0_102 = arith.constant 0 : index
    %72 = vector.load %arg3[%c10, %c0_101, %c0_102] : memref<12x8x8xbf16, #tpu.memory_space<vmem>>, vector<1x8x8xbf16>
    %73 = vector.shape_cast %72 : vector<1x8x8xbf16> to vector<8x8xbf16>
    %cst_103 = arith.constant dense<0.000000e+00> : vector<8x8x8xf32>
    %74 = tpu.matmul %71, %73, %cst_103 {dimension_numbers = #tpu.dot_dimension_numbers<[2], [0], [0, 1], [1], [0, 0, 0, 1, 1, 1], [], []>} : vector<8x8x8xbf16>, vector<8x8xbf16>, vector<8x8x8xf32> -> vector<8x8x8xf32>
    %75 = arith.addf %69, %74 : vector<8x8x8xf32>
    %c0_104 = arith.constant 0 : index
    %c1_105 = arith.constant 1 : index
    %c2_106 = arith.constant 2 : index
    %c0_107 = arith.constant 0 : index
    %76 = vector.load %arg8[%c0_104, %c1_105, %c2_106, %c0_107] : memref<1x9x10x8xbf16, #tpu.memory_space<vmem>>, vector<1x8x8x8xbf16>
    %77 = vector.shape_cast %76 : vector<1x8x8x8xbf16> to vector<8x8x8xbf16>
    %c11 = arith.constant 11 : index
    %c0_108 = arith.constant 0 : index
    %c0_109 = arith.constant 0 : index
    %78 = vector.load %arg3[%c11, %c0_108, %c0_109] : memref<12x8x8xbf16, #tpu.memory_space<vmem>>, vector<1x8x8xbf16>
    %79 = vector.shape_cast %78 : vector<1x8x8xbf16> to vector<8x8xbf16>
    %cst_110 = arith.constant dense<0.000000e+00> : vector<8x8x8xf32>
    %80 = tpu.matmul %77, %79, %cst_110 {dimension_numbers = #tpu.dot_dimension_numbers<[2], [0], [0, 1], [1], [0, 0, 0, 1, 1, 1], [], []>} : vector<8x8x8xbf16>, vector<8x8xbf16>, vector<8x8x8xf32> -> vector<8x8x8xf32>
    %81 = arith.addf %75, %80 : vector<8x8x8xf32>
    %c0_111 = arith.constant 0 : index
    %c0_112 = arith.constant 0 : index
    %82 = vector.load %arg4[%c0_111, %c0_112] : memref<1x8xf32, #tpu.memory_space<vmem>>, vector<1x8xf32>
    %83 = vector.shape_cast %82 : vector<1x8xf32> to vector<1x1x8xf32>
    %84 = vector.broadcast %83 : vector<1x1x8xf32> to vector<8x8x8xf32>
    %85 = arith.mulf %81, %84 : vector<8x8x8xf32>
    %c0_113 = arith.constant 0 : index
    %c0_114 = arith.constant 0 : index
    %86 = vector.load %arg5[%c0_113, %c0_114] : memref<1x8xf32, #tpu.memory_space<vmem>>, vector<1x8xf32>
    %87 = vector.shape_cast %86 : vector<1x8xf32> to vector<1x1x8xf32>
    %88 = vector.broadcast %87 : vector<1x1x8xf32> to vector<8x8x8xf32>
    %89 = arith.addf %85, %88 : vector<8x8x8xf32>
    %cst_115 = arith.constant 0.000000e+00 : f32
    %90 = vector.broadcast %cst_115 : f32 to vector<8x8x8xf32>
    %91 = arith.cmpf oge, %89, %90 : vector<8x8x8xf32>
    %cst_116 = arith.constant 0.00999999977 : f32
    %92 = vector.broadcast %cst_116 : f32 to vector<8x8x8xf32>
    %93 = arith.mulf %92, %89 : vector<8x8x8xf32>
    %94 = arith.select %91, %89, %93 : vector<8x8x8xi1>, vector<8x8x8xf32>
    %95 = vector.shape_cast %94 : vector<8x8x8xf32> to vector<1x8x8x8xf32>
    %c0_117 = arith.constant 0 : index
    %c0_118 = arith.constant 0 : index
    %c0_119 = arith.constant 0 : index
    %c0_120 = arith.constant 0 : index
    %96 = vector.load %arg6[%c0_117, %c0_118, %c0_119, %c0_120] : memref<1x8x8x8xf32, #tpu.memory_space<vmem>>, vector<1x8x8x8xf32>
    tpu.vector_store %arg6[%c0_117, %c0_118, %c0_119, %c0_120], %95 {strides = array<i32>} : memref<1x8x8x8xf32, #tpu.memory_space<vmem>>, vector<1x8x8x8xf32>,
    return
  }
  func.func @transform_0(%arg0: i32) -> (i32, i32, i32, i32, i32) {
    %c0_i32 = arith.constant 0 : i32
    %c0_i32_0 = arith.constant 0 : i32
    %c0_i32_1 = arith.constant 0 : i32
    %c0_i32_2 = arith.constant 0 : i32
    %c0_i32_3 = arith.constant 0 : i32
    return %arg0, %c0_i32, %c0_i32_0, %c0_i32_1, %c0_i32_2 : i32, i32, i32, i32, i32
  }
  func.func @transform_1(%arg0: i32) -> (i32, i32, i32, i32, i32) {
    %c0_i32 = arith.constant 0 : i32
    %c1_i32 = arith.constant 1 : i32
    %c0_i32_0 = arith.constant 0 : i32
    %c0_i32_1 = arith.constant 0 : i32
    %c0_i32_2 = arith.constant 0 : i32
    return %arg0, %c0_i32, %c1_i32, %c0_i32_0, %c0_i32_1 : i32, i32, i32, i32, i32
  }
  func.func @transform_2(%arg0: i32) -> (i32, i32, i32) {
    %c0_i32 = arith.constant 0 : i32
    %c0_i32_0 = arith.constant 0 : i32
    %c0_i32_1 = arith.constant 0 : i32
    %c0_i32_2 = arith.constant 0 : i32
    return %c0_i32, %c0_i32_0, %c0_i32_1 : i32, i32, i32
  }
  func.func @transform_3(%arg0: i32) -> (i32, i32) {
    %c0_i32 = arith.constant 0 : i32
    %c0_i32_0 = arith.constant 0 : i32
    %c0_i32_1 = arith.constant 0 : i32
    return %c0_i32, %c0_i32_0 : i32, i32
  }
  func.func @transform_4(%arg0: i32) -> (i32, i32) {
    %c0_i32 = arith.constant 0 : i32
    %c0_i32_0 = arith.constant 0 : i32
    %c0_i32_1 = arith.constant 0 : i32
    return %c0_i32, %c0_i32_0 : i32, i32
  }
  func.func @transform_5(%arg0: i32) -> (i32, i32, i32, i32) {
    %c0_i32 = arith.constant 0 : i32
    %c0_i32_0 = arith.constant 0 : i32
    %c0_i32_1 = arith.constant 0 : i32
    %c0_i32_2 = arith.constant 0 : i32
    return %arg0, %c0_i32, %c0_i32_0, %c0_i32_1 : i32, i32, i32, i32
  }
}

</mosaic_0001>

<bundles_post_ra>
// kernel: tpu_custom_call.1
= control target key start
LH: loop header
LB: loop body
LE: loop exit
PB: predicated region body
PF: predicated region fallthrough
CT: control target
= control target key end

     0   :  { %s3630_s0 = inlined_call_operand.hbm [shape: bf16[2,8,2,8,8], index: 0, kind: input, shape index: {}]   ;;  %s3631_s1 = inlined_call_operand.hbm [shape: bf16[2,8,2,8,8], index: 1, kind: input, shape index: {}]   ;;  %s3632_s2 = inlined_call_operand.vmem [shape: bf16[12,8,8], index: 2, kind: input, shape index: {}]   ;;  %s3633_s3 = inlined_call_operand.vmem [shape: f32[1,8], index: 3, kind: input, shape index: {}]   ;;  %s3634_s4 = inlined_call_operand.vmem [shape: f32[1,8], index: 4, kind: input, shape index: {}]   ;;  %s3635_s5 = inlined_call_operand.hbm [shape: f32[2,8,8,8], index: 5, kind: output, shape index: {}]  }
   0x1   :  { %3641 = sst [smem:[#allocation16_spill]] %s3630_s0 }
   0x2   :  { %10 = vsyncpa [#allocation5], 0 }
   0x3   :  { %12 = vsyncpa [#allocation5 + $0x1], 0 }
   0x4   :  { %13 = vsyncpa [#allocation8], 0 }
   0x5   :  { %15 = vsyncpa [#allocation8 + $0x1], 0 }
   0x6   :  { %16 = vsyncpa [#allocation6], 0 }
   0x7   :  { %18 = vsyncpa [#allocation6 + $0x1], 0  ;;  %s2771_s18 = smov 0   ;;  %s2773_s19 = smov 0  }
   0x8   :  { %s2775_s20 = smov 0   ;;  %s2777_s21 = smov 0  }
   0x9 LB: > { %3642 = sst [smem:[#allocation13_spill]] %s2729_s20  ;;  %s2792_s22 = sadd.s32 4294967295, %s2733_s21   ;;  %s2733_s21 = sphi %s2777_s21, %s3662_s21   ;;  %s2729_s20 = sphi %s2775_s20, %s3664_s20   ;;  %s2725_s19 = sphi %s2773_s19, %s3666_s19   ;;  %s2721_s18 = sphi %s2771_s18, %s3665_s18  }
   0xa   : > { %s2352_s23 = sadd.s32 4294967294, %s2733_s21   ;;  %s2796_s24 = sadd.s32 1, %s2733_s21  }
   0xb   : > { %3643 = sst [smem:[#allocation14_spill]] %s2796_s24  ;;  %s31_s25 = sadd.s32 1, %s2729_s20 }
   0xc   : > { %s28_s26 = ssub.s32 %s2733_s21, %s2796_s24  ;;  %p38_p0 = scmp.ne.s32.totalorder %s2729_s20, %s2725_s19 }
   0xd   : > { %p29_p1 = scmp.eq.s32.totalorder %s28_s26, 0  ;;  %p39_p2 = scmp.eq.s32.totalorder %s2733_s21, 0 }
   0xe   : > { %p44_p3 = scmp.ne.s32.totalorder %s2725_s19, %s2721_s18  ;;  %p45_p4 = scmp.eq.s32.totalorder %s2792_s22, 0 }
   0xf   : > { %s2808_s27 = scalar_select %p29_p1, %s2729_s20, %s31_s25  }
  0x10   : > { %p2810_p5 = por %p39_p2, %p38_p0  ;;  %p2814_p6 = por %p45_p4, %p44_p3 }
  0x11   : > { %3644 = sst [smem:[#allocation15_spill]] %s2808_s27  ;;  %p157_p7 = scmp.eq.s32.totalorder %s2792_s22, 1 }
  0x12   : > { %p163_p8 = scmp.eq.s32.totalorder %s2352_s23, 1  ;;  %p2354_p9 = scmp.ge.s32.totalorder %s2733_s21, 2 }
  0x13   : > { %p2561_p10 = scmp.lt.s32.totalorder %s2733_s21, 2  ;;  %p2821_p11 = por %p157_p7, %p38_p0 }
  0x14   : > { %p2825_p12 = por %p163_p8, %p44_p3  ;;  %s2830_s7 = sand.u32 1, %s2729_s20  }
  0x15   : > { %s3637_s8 = sshll.u32 %s2733_s21, 6  ;;  %s3636_s9 = sshll.u32 %s2830_s7, 5 }
  0x16   : > { %s3649_s0 = sld [smem:[#allocation16_spill]]  ;;  %s196_s14 = scalar_lea.vmem [#allocation4], %s3636_s9 }
  0x17   : > { %s204_s15 = sshll.u32 %s196_s14, 4  ;;  %p2843_p13 = pnand %p2561_p10, %p2810_p5  ;;  %s205_s15 = int_to_ptr.vmem [resolvable:$true] %s204_s15 }
  0x18   : > { %p2361_p0 = scmp.ge.s32.totalorder %s2733_s21, 1  ;;  %s193_s17 = scalar_lea.sflag [#allocation5], %s2830_s7 }
  0x19   : > { %p2607_p2 = pneg %p2843_p13 }
  0x1c   : > { %s201_s12 = scalar_lea.hbm %s3649_s0, %s3637_s8  ;;  %s2610_s10 = scalar_lea.hbm %s3649_s0, 128 }
  0x1d   : > { %s202_s13 = sshll.u32 %s201_s12, 4  ;;  %s203_s13 = int_to_ptr.hbm [resolvable:$true] %s202_s13 }
  0x1e   : > { %s2603_s23 = sshra.s32 %s203_s13, 4  ;;  %s2604_s23 = int_to_ptr.hbm [resolvable:$true] %s2603_s23 }
  0x1f   : > { %s2605_s25 = scalar_lea.hbm %s2604_s23, 32  ;;  %p2611_p5 = scmp.lt.s32.totalorder %s2604_s23, %s3649_s0 }
  0x20   : > { %p2606_p1 = scmp.ne.s32.totalorder %s2604_s23, %s2605_s25  ;;  %p2612_p7 = scmp.lt.s32.totalorder %s2610_s10, %s2605_s25 }
  0x22   : > { %p2608_p3 = pnand %p2607_p2, %p2606_p1  ;;  %p2613_p8 = por %p2612_p7, %p2611_p5 }
  0x24   : > { %p2609_p4 = pneg %p2608_p3 }
  0x26   : > { %p2614_p10 = pnand %p2613_p8, %p2609_p4 }
  0x28   : > { %2617 = shalt.err (!%p2614_p10)
}
  0x29   : > { %s2735_s14 = smov 128   ;;  %s2736_s9 = smov 64  }
  0x2a   : > { %s2737_s8 = smov 4   ;;  %p235_p1 = scmp.lt.s32.totalorder %s2733_s21, 3 }
  0x2b   : > { %2553 = dma.hbm_to_vmem [thread:$0]  (!%p2843_p13), %s203_s13, 512, %s205_s15, %s193_s17, %s2735_s14, %s2736_s9, %s2737_s8  }
  0x2c   : > { %s3651_s23 = sshll.u32 %s2733_s21, 6  ;;  %p2872_p3 = pnand %p2361_p0, %p235_p1 }
  0x2d   : > { %s2294_s28 = scalar_lea.hbm %s3631_s1, %s3651_s23  ;;  %s3653_s0 = sshll.u32 %s2830_s7, 5 }
  0x2e   : > { %s2295_s11 = scalar_lea.hbm %s2294_s28, 4  ;;  %s218_s27 = scalar_lea.vmem [#allocation7], %s3653_s0 }
  0x2f   : > { %s225_s12 = sshll.u32 %s2295_s11, 4  ;;  %s227_s20 = sshll.u32 %s218_s27, 4  ;;  %s226_s12 = int_to_ptr.hbm [resolvable:$true] %s225_s12  ;;  %s228_s20 = int_to_ptr.vmem [resolvable:$true] %s227_s20 }
  0x30   : > { %s215_s24 = scalar_lea.sflag [#allocation8], %s2830_s7  ;;  %s2633_s13 = sshra.s32 %s226_s12, 4  ;;  %s2634_s13 = int_to_ptr.hbm [resolvable:$true] %s2633_s13 }
  0x31   : > { %s2635_s15 = scalar_lea.hbm %s2634_s13, 32  ;;  %s2640_s25 = scalar_lea.hbm %s3631_s1, 128 }
  0x32   : > { %p2636_p4 = scmp.ne.s32.totalorder %s2634_s13, %s2635_s15  ;;  %p2641_p0 = scmp.lt.s32.totalorder %s2634_s13, %s3631_s1 }
  0x33   : > { %p2642_p8 = scmp.lt.s32.totalorder %s2640_s25, %s2635_s15 }
  0x34   : > { %p2638_p5 = pnand %p2636_p4, %p2607_p2 }
  0x35   : > { %p2643_p10 = por %p2642_p8, %p2641_p0 }
  0x36   : > { %p2639_p7 = pneg %p2638_p5 }
  0x38   : > { %p2644_p1 = pnand %p2643_p10, %p2639_p7 }
  0x3a   : > { %2647 = shalt.err (!%p2644_p1)
}
  0x3b   : > { %2556 = dma.hbm_to_vmem [thread:$0]  (!%p2843_p13), %s226_s12, 512, %s228_s20, %s215_s24, %s2735_s14, %s2736_s9, %s2737_s8  }
  0x3c   : > { %239 = sbr.rel (%p2872_p3) target bundleno = 447 (0x1bf), region = 40  ;;  %s2895_s0 = sand.u32 (!%p2872_p3), 1, %s2725_s19  }
  0x3d   : > { %s2362_s27 = sshll.u32 (!%p2872_p3), %s2895_s0, 5  ;;  %s242_s7 = scalar_lea.sflag (!%p2872_p3), [#allocation5], %s2895_s0 }
  0x3e   : > { %s2899_s11 = scalar_lea.vmem (!%p2872_p3), [#allocation4], %s2362_s27 }
  0x41   : > { %2708 = dma.done.wait (%p2814_p6), %s242_s7, 512  }
  0x42   : > { %2710 = vsyncadd (%p2814_p6), %s242_s7, 4294966784  ;;  %s252_s20 = scalar_lea.sflag [#allocation8], %s2895_s0  ;;  %s2906_s24 = scalar_lea.vmem [#allocation7], %s2362_s27 }
  0x43   : > { %2712 = dma.done.wait (%p2814_p6), %s252_s20, 512  }
  0x44   : > { %2714 = vsyncadd (%p2814_p6), %s252_s20, 4294966784  ;;  %vm289_vm0 = vcmask 60416   ;;  %v2738_v0 = vmov 0   ;;  %vm765_vm1 = vcmask 1043456   ;;  %v2403_v1 = vld [vmem:[%s3632_s2 + $0xc] sm:$0xf] }
  0x45   : > { %293 = vst.msk [vmem:[#allocation2 + $0x8] sm:$0xf] %vm289_vm0, %v2738_v0  ;;  %v614_v2 = vld [vmem:[%s3632_s2] sm:$0xf]  ;;  %v2390_v3 = vld [vmem:[%s3632_s2 + $0x8] sm:$0xf] }
  0x46   : > { %295 = vst.msk [vmem:[#allocation2 + $0x10] sm:$0xf] %vm289_vm0, %v2738_v0  ;;  %v1031_v4 = vsel %vm765_vm1, %v2403_v1, 0  ;;  %v831_v5 = vsel %vm765_vm1, %v614_v2, 0  ;;  %v948_v6 = vsel %vm765_vm1, %v2390_v3, 0  ;;  %vm291_vm4 = vcmask 57344  }
  0x47   : > { %290 = vst.msk [vmem:[#allocation2] sm:$0xf] %vm289_vm0, %v2738_v0  ;;  %v328_v7 = vld [vmem:[%s2899_s11 + $0x4] sm:$0xf]  ;;  %1040 = vmatpush.bf16.msra.mxu3 %v1031_v4  ;;  %840 = vmatpush.bf16.msra.mxu1 %v831_v5  ;;  %v329_v8 = vld [vmem:[%s2899_s11 + $0x8] sm:$0xf] }
  0x48   : > { %297 = vst.msk [vmem:[#allocation2 + $0x18] sm:$0xf] %vm289_vm0, %v2738_v0  ;;  %v344_v9 = vshrl.u32 %v328_v7, 16  ;;  %v347_v10 = vshll.u32 %v328_v7, 16  ;;  %vm416_vm2 = vsmask.f32 7938  ;;  %957 = vmatpush.bf16.msra.mxu2 %v948_v6 }
  0x49   : > { %299 = vst.msk [vmem:[#allocation2 + $0x20] sm:$0xf] %vm289_vm0, %v2738_v0  ;;  %v352_v11 = vshrl.u32 %v329_v8, 16  ;;  %v355_v12 = vshll.u32 %v329_v8, 16  ;;  %v327_v14 = vld [vmem:[%s2899_s11] sm:$0xf]  ;;  %vm2948_vm3 = vmand %vm289_vm0, %vm416_vm2 }
  0x4a   : > { %301 = vst.msk [vmem:[#allocation2 + $0x28] sm:$0xf] %vm289_vm0, %v2738_v0  ;;  %v2940_v13 = vrot.slane %v344_v9, 7  ;;  %v336_v18 = vshrl.u32 %v327_v14, 16  ;;  %v339_v21 = vshll.u32 %v327_v14, 16  ;;  %vm752_vm5 = vcmask 64512  }
  0x4b   : > { %303 = vst.msk [vmem:[#allocation2 + $0x30] sm:$0xf] %vm289_vm0, %v2738_v0  ;;  %v2945_v15 = vrot.slane %v352_v11, 7  ;;  %v2365_v28 = vld [vmem:[%s3632_s2 + $0x4] sm:$0xf]  ;;  %vm888_vm8 = vcmask 1042432  }
  0x4c   : > { %305 = vst.msk [vmem:[#allocation2 + $0x38] sm:$0xf] %vm289_vm0, %v2738_v0  ;;  %v427_v17 = vld [vmem:[#allocation2 + $0x8] sm:$0xf]  ;;  %v349_v19 = vor.u32 %v347_v10, %v2940_v13  ;;  %v2960_v23 = vrot.slane %v336_v18, 7  ;;  %v767_v30 = vsel %vm765_vm1, %v2365_v28, 0 }
  0x4d   : > { %307 = vst.msk [vmem:[#allocation2 + $0x40] sm:$0xf] %vm289_vm0, %v2738_v0  ;;  %v433_v20 = vld [vmem:[#allocation2 + $0x10] sm:$0xf]  ;;  %v357_v22 = vor.u32 %v355_v12, %v2945_v15  ;;  %v2442_v29 = vld [vmem:[%s3632_s2 + $0x18] sm:$0xf]  ;;  %776 = vmatpush.bf16.msra.mxu0 %v767_v30 }
  0x4e   : > { %309 = vst.msk [vmem:[#allocation3] sm:$0xf] %vm289_vm0, %v2738_v0  ;;  %v428_v24 = vsel %vm2948_vm3, %v349_v19, %v427_v17  ;;  %v341_v26 = vor.u32 %v339_v21, %v2960_v23  ;;  %v418_v27 = vld [vmem:[#allocation2] sm:$0xf]  ;;  %v1429_v31 = vsel %vm765_vm1, %v2442_v29, 0  ;;  %v350_v49 = vrot.slane %v2940_v13, 4 }
  0x4f   : > { %311 = vst.msk [vmem:[#allocation3 + $0x8] sm:$0xf] %vm289_vm0, %v2738_v0  ;;  %v434_v25 = vsel %vm2948_vm3, %v357_v22, %v433_v20  ;;  %1438 = vmatpush.bf16.msrb.mxu2 %v1429_v31  ;;  %v2424_v32 = vld [vmem:[%s3632_s2 + $0x10] sm:$0xf]  ;;  %v2463_v33 = vld [vmem:[%s3632_s2 + $0x1c] sm:$0xf] }
  0x50   : > { %313 = vst.msk [vmem:[#allocation3 + $0x10] sm:$0xf] %vm289_vm0, %v2738_v0  ;;  %v419_v34 = vsel %vm2948_vm3, %v341_v26, %v418_v27  ;;  %v1225_v35 = vsel %vm765_vm1, %v2424_v32, 0  ;;  %v1623_v36 = vsel %vm765_vm1, %v2463_v33, 0  ;;  %v2429_v37 = vld [vmem:[%s3632_s2 + $0x14] sm:$0xf] }
  0x51   : > { %429 = vst [vmem:[#allocation2 + $0x8] sm:$0xf] %v428_v24  ;;  %1234 = vmatpush.bf16.msrb.mxu0 %v1225_v35  ;;  %1632 = vmatpush.bf16.msrb.mxu3 %v1623_v36  ;;  %v1347_v38 = vsel %vm765_vm1, %v2429_v37, 0  ;;  %v330_v39 = vld [vmem:[%s2899_s11 + $0xc] sm:$0xf]  ;;  %v342_v50 = vrot.slane %v2960_v23, 4 }
  0x52   : > { %435 = vst [vmem:[#allocation2 + $0x10] sm:$0xf] %v434_v25  ;;  %1356 = vmatpush.bf16.msrb.mxu1 %v1347_v38  ;;  %v3005_v41 = vld [vmem:[%s2899_s11 + $0x10] sm:$0xf]  ;;  %v360_v45 = vshrl.u32 %v330_v39, 16  ;;  %vm889_vm9 = vcmask 1046532  }
  0x53   : > { %315 = vst.msk [vmem:[#allocation3 + $0x18] sm:$0xf] %vm289_vm0, %v2738_v0  ;;  %v368_v46 = vshrl.u32 %v3005_v41, 16  ;;  %vm422_vm6 = vsmask.f32 256  ;;  %v363_v54 = vshll.u32 %v330_v39, 16  ;;  %vm3069_vm12 = vmor %vm888_vm8, %vm889_vm9 }
  0x54   : > { %317 = vst.msk [vmem:[#allocation3 + $0x20] sm:$0xf] %vm289_vm0, %v2738_v0  ;;  %vm3022_vm7 = vmand %vm291_vm4, %vm422_vm6  ;;  %v3028_v53 = vrot.slane %v360_v45, 7  ;;  %v371_v56 = vshll.u32 %v3005_v41, 16  ;;  %vm625_vm10 = vsmask.f32 3328 }
  0x55   : > { %319 = vst.msk [vmem:[#allocation3 + $0x28] sm:$0xf] %vm289_vm0, %v2738_v0  ;;  %v3030_v55 = vrot.slane %v368_v46, 7  ;;  %vm626_vm11 = vsmask.f32 7440  ;;  %v358_v8 = vrot.slane %v2945_v15, 4 }
  0x56   : > { %321 = vst.msk [vmem:[#allocation3 + $0x30] sm:$0xf] %vm289_vm0, %v2738_v0  ;;  %v332_v7 = vld [vmem:[%s2899_s11 + $0x14] sm:$0xf]  ;;  %v365_v14 = vor.u32 %v363_v54, %v3028_v53  ;;  %v333_v17 = vld [vmem:[%s2899_s11 + $0x18] sm:$0xf]  ;;  %vm3084_vm13 = vmor %vm625_vm10, %vm626_vm11 }
  0x57   : > { %323 = vst.msk [vmem:[#allocation3 + $0x38] sm:$0xf] %vm289_vm0, %v2738_v0  ;;  %v366_v18 = vrot.slane %v3028_v53, 4  ;;  %v439_v19 = vld [vmem:[#allocation2 + $0x18] sm:$0xf]  ;;  %v376_v15 = vshrl.u32 %v332_v7, 16  ;;  %v373_v24 = vor.u32 %v371_v56, %v3030_v55 }
  0x58   : > { %v2406_v40 = vld [vmem:[#allocation2 + $0x8] sm:$0xf]  ;;  %325 = vst.msk [vmem:[#allocation3 + $0x40] sm:$0xf] %vm289_vm0, %v2738_v0  ;;  %v384_v21 = vshrl.u32 %v333_v17, 16  ;;  %v379_v26 = vshll.u32 %v332_v7, 16 }
  0x59   : > { %v2531_v42 = vld [vmem:[#allocation2 + $0xc] sm:$0xf0]  ;;  %420 = vst [vmem:[#allocation2] sm:$0xf] %v419_v34  ;;  %v607_v44 = vld [vmem:[#allocation2 + $0x8] sm:$0xf] }
  0x5a   : > { %v2407_v43 = vor.u32 %v2531_v42, %v2406_v40  ;;  %292 = vst.msk [vmem:[#allocation2 + $0x4] sm:$0x1] %vm291_vm4, %v2738_v0  ;;  %v643_v47 = vshrl.u32 %v607_v44, 16  ;;  %v646_v48 = vshll.u32 %v607_v44, 16  ;;  %v2527_v51 = vld [vmem:[#allocation2 + $0x4] sm:$0xf0] }
  0x5b   : > { %294 = vst.msk [vmem:[#allocation2 + $0xc] sm:$0x1] %vm291_vm4, %v2738_v0  ;;  %v608_v62 = vld [vmem:[#allocation2 + $0x10] sm:$0xf]  ;;  %v3039_v2 = vld [vmem:[#allocation2 + $0x8] sm:$0xe] }
  0x5c   : > { %2420 = vmatmul.msk.bf16.vlgmr.msra.gmra.mxu3 %vm752_vm5, %v2407_v43  ;;  %296 = vst.msk [vmem:[#allocation2 + $0x14] sm:$0x1] %vm291_vm4, %v2738_v0  ;;  %v645_v58 = vrot.slane %v643_v47, 4  ;;  %v648_v59 = vrot.slane %v646_v48, 5  ;;  %v657_v10 = vshrl.u32 %v608_v62, 16  ;;  %v660_v20 = vshll.u32 %v608_v62, 16 }
  0x5d   : > { %298 = vst.msk [vmem:[#allocation2 + $0x1c] sm:$0x1] %vm291_vm4, %v2738_v0  ;;  %v2392_v22 = vrot.slane %v3039_v2, 9  ;;  %v445_v25 = vld [vmem:[#allocation2 + $0x20] sm:$0xf]  ;;  %v3061_v29 = vrot.slane %v376_v15, 7  ;;  %v440_v43 = vsel %vm2948_vm3, %v365_v14, %v439_v19 }
  0x5e   : > { %300 = vst.msk [vmem:[#allocation2 + $0x24] sm:$0x1] %vm291_vm4, %v2738_v0  ;;  %v649_v13 = vor.u32 %v648_v59, %v645_v58  ;;  %v3063_v30 = vrot.slane %v384_v21, 7  ;;  %v387_v31 = vshll.u32 %v333_v17, 16  ;;  %v659_v34 = vrot.slane %v657_v10, 4  ;;  %s2364_s17 = sshll.u32 %s2895_s0, 6 }
  0x5f   : > { %302 = vst.msk [vmem:[#allocation2 + $0x2c] sm:$0x1] %vm291_vm4, %v2738_v0  ;;  %v662_v38 = vrot.slane %v660_v20, 5  ;;  %v451_v39 = vld [vmem:[#allocation2 + $0x28] sm:$0xf]  ;;  %v381_v44 = vor.u32 %v379_v26, %v3061_v29  ;;  %v446_v48 = vsel %vm2948_vm3, %v373_v24, %v445_v25  ;;  %v374_v54 = vrot.slane %v3030_v55, 4 }
  0x60   : > { %v2372_v57 = vld [vmem:[#allocation2] sm:$0xf]  ;;  %304 = vst.msk [vmem:[#allocation2 + $0x34] sm:$0x1] %vm291_vm4, %v2738_v0  ;;  %v650_v32 = vrot.slane %v649_v13, 4  ;;  %v390_v20 = vrot.slane %v3063_v30, 4 }
  0x61   : > { %v2373_v60 = vor.u32 %v2527_v51, %v2372_v57  ;;  %v424_v61 = vld [vmem:[#allocation2 + $0x4] sm:$0x1]  ;;  %306 = vst.msk [vmem:[#allocation2 + $0x3c] sm:$0x1] %vm291_vm4, %v2738_v0  ;;  %v606_v3 = vld [vmem:[#allocation2] sm:$0xf]  ;;  %v452_v55 = vsel %vm2948_vm3, %v381_v44, %v451_v39 }
  0x62   : > { %v425_v63 = vsel %vm3022_vm7, %v342_v50, %v424_v61  ;;  %v430_v1 = vld [vmem:[#allocation2 + $0xc] sm:$0x1]  ;;  %308 = vst.msk [vmem:[#allocation2 + $0x44] sm:$0x1] %vm291_vm4, %v2738_v0  ;;  %v629_v5 = vshrl.u32 %v606_v3, 16  ;;  %v632_v6 = vshll.u32 %v606_v3, 16 }
  0x63   : > { %2386 = vmatmul.msk.bf16.vlgmr.msra.gmra.mxu1 %vm752_vm5, %v2373_v60  ;;  %426 = vst [vmem:[#allocation2 + $0x4] sm:$0x1] %v425_v63  ;;  %v431_v4 = vsel %vm3022_vm7, %v350_v49, %v430_v1  ;;  %v862_v9 = vld [vmem:[#allocation2] sm:$0xe]  ;;  %v436_v28 = vld [vmem:[#allocation2 + $0x14] sm:$0x1]  ;;  %v389_v49 = vor.u32 %v387_v31, %v3063_v30 }
  0x64   : > { %432 = vst [vmem:[#allocation2 + $0xc] sm:$0x1] %v431_v4  ;;  %v631_v11 = vrot.slane %v629_v5, 4  ;;  %v634_v12 = vrot.slane %v632_v6, 5  ;;  %v2391_v27 = vrot.slane %v862_v9, 9  ;;  %v437_v56 = vsel %vm3022_vm7, %v358_v8, %v436_v28  ;;  %s3544_s23 = scalar_lea.vmem [#allocation9], %s2364_s17 }
  0x65   : > { %310 = vst.msk [vmem:[#allocation3 + $0x4] sm:$0x1] %vm291_vm4, %v2738_v0  ;;  %v442_v33 = vld [vmem:[#allocation2 + $0x1c] sm:$0x1]  ;;  %v457_v50 = vld [vmem:[#allocation2 + $0x30] sm:$0xf]  ;;  %v663_v4 = vor.u32 %v662_v38, %v659_v34 }
  0x66   : > { %312 = vst.msk [vmem:[#allocation3 + $0xc] sm:$0x1] %vm291_vm4, %v2738_v0  ;;  %v635_v23 = vor.u32 %v634_v12, %v631_v11  ;;  %v448_v57 = vld [vmem:[#allocation2 + $0x24] sm:$0x1]  ;;  %v443_v61 = vsel %vm3022_vm7, %v366_v18, %v442_v33  ;;  %v334_v62 = vld [vmem:[%s2899_s11 + $0x1c] sm:$0xf]  ;;  %v458_v5 = vsel %vm2948_vm3, %v389_v49, %v457_v50 }
  0x67   : > { %314 = vst.msk [vmem:[#allocation3 + $0x14] sm:$0x1] %vm291_vm4, %v2738_v0  ;;  %v392_v1 = vshrl.u32 %v334_v62, 16  ;;  %v864_v8 = vld [vmem:[#allocation2 + $0x10] sm:$0xe]  ;;  %v382_v9 = vrot.slane %v3061_v29, 4  ;;  %v449_v10 = vsel %vm3022_vm7, %v374_v54, %v448_v57 }
  0x68   : > { %316 = vst.msk [vmem:[#allocation3 + $0x1c] sm:$0x1] %vm291_vm4, %v2738_v0  ;;  %v636_v37 = vrot.slane %v635_v23, 4  ;;  %v454_v11 = vld [vmem:[#allocation2 + $0x2c] sm:$0x1]  ;;  %v395_v13 = vshll.u32 %v334_v62, 16 }
  0x69   : > { %318 = vst.msk [vmem:[#allocation3 + $0x24] sm:$0x1] %vm291_vm4, %v2738_v0  ;;  %v394_v12 = vrot.slane %v392_v1, 7  ;;  %v2376_v17 = vld [vmem:[#allocation2 + $0x10] sm:$0xf]  ;;  %v2393_v18 = vrot.slane %v864_v8, 9  ;;  %v455_v23 = vsel %vm3022_vm7, %v382_v9, %v454_v11 }
  0x6a   : > { %v615_v35 = vld [vmem:[#allocation2 + $0x4] sm:$0x1]  ;;  %320 = vst.msk [vmem:[#allocation3 + $0x2c] sm:$0x1] %vm291_vm4, %v2738_v0  ;;  %v664_v19 = vrot.slane %v663_v4, 4  ;;  %s2543_s25 = sshll.u32 %s2792_s22, 6 }
  0x6b   : > { %v616_v40 = vld [vmem:[#allocation2 + $0xc] sm:$0x1]  ;;  %v893_v41 = vrot.slane %v615_v35, 5  ;;  %322 = vst.msk [vmem:[#allocation3 + $0x34] sm:$0x1] %vm291_vm4, %v2738_v0  ;;  %v638_v42 = vshll.u32 %v615_v35, 16  ;;  %s2250_s27 = scalar_lea.hbm %s3635_s5, %s2543_s25 }
  0x6c   : > { %v897_v45 = vrot.slane %v616_v40, 5  ;;  %324 = vst.msk [vmem:[#allocation3 + $0x3c] sm:$0x1] %vm291_vm4, %v2738_v0  ;;  %v652_v47 = vshll.u32 %v616_v40, 16  ;;  %v463_v28 = vld [vmem:[#allocation2 + $0x38] sm:$0xf] }
  0x6d   : > { %v894_v51 = vsel %vm3069_vm12, %v2391_v27, %v893_v41  ;;  %326 = vst.msk [vmem:[#allocation3 + $0x44] sm:$0x1] %vm291_vm4, %v2738_v0  ;;  %v640_v53 = vrot.slane %v638_v42, 5  ;;  %v397_v27 = vor.u32 %v395_v13, %v394_v12  ;;  %v398_v44 = vrot.slane %v394_v12, 4  ;;  %s2251_s7 = sshll.u32 %s3544_s23, 4  ;;  %s2253_s11 = sshll.u32 %s2250_s27, 4  ;;  %s2252_s7 = int_to_ptr.vmem [resolvable:$true] %s2251_s7  ;;  %s2254_s11 = int_to_ptr.hbm [resolvable:$true] %s2253_s11 }
  0x6e   : > { %v898_v58 = vsel %vm3069_vm12, %v2392_v22, %v897_v45  ;;  %v923_v59 = vunpack.c.l.b16 %v894_v51  ;;  %v654_v60 = vrot.slane %v652_v47, 5  ;;  %441 = vst [vmem:[#allocation2 + $0x18] sm:$0xf] %v440_v43  ;;  %v460_v47 = vld [vmem:[#allocation2 + $0x34] sm:$0x1]  ;;  %s2239_s22 = scalar_lea.sflag [#allocation6], %s2895_s0 }
  0x6f   : > { %v924_v63 = vunpack.c.l.b16 %v898_v58  ;;  %v641_v0 = vsel %vm3084_vm13, %v636_v37, %v640_v53  ;;  %447 = vst [vmem:[#allocation2 + $0x20] sm:$0xf] %v446_v48  ;;  %v464_v45 = vsel %vm2948_vm3, %v397_v27, %v463_v28  ;;  %v466_v53 = vld [vmem:[#allocation2 + $0x3c] sm:$0x1]  ;;  %v469_v27 = vld [vmem:[%s2906_s24] sm:$0xf] }
  0x70   : > { %v655_v2 = vsel %vm3084_vm13, %v650_v32, %v654_v60  ;;  %v740_v3 = vunpack.c.l.b16 %v641_v0  ;;  %438 = vst [vmem:[#allocation2 + $0x14] sm:$0x1] %v437_v56  ;;  %s2677_s20 = sshra.s32 %s2254_s11, 4  ;;  %s2683_s16 = scalar_lea.hbm %s3635_s5, 128  ;;  %s2678_s20 = int_to_ptr.hbm [resolvable:$true] %s2677_s20 }
  0x71   : > { %v931_v6 = vpack.c.b16 %v924_v63, %v923_v59  ;;  %v741_v7 = vunpack.c.l.b16 %v655_v2  ;;  %444 = vst [vmem:[#allocation2 + $0x1c] sm:$0x1] %v443_v61  ;;  %v461_v61 = vsel %vm3022_vm7, %v390_v20, %v460_v47  ;;  %v467_v2 = vsel %vm3022_vm7, %v398_v44, %v466_v53  ;;  %s2679_s29 = scalar_lea.hbm %s2678_s20, 64  ;;  %p2684_p3 = scmp.lt.s32.totalorder %s2678_s20, %s3635_s5 }
  0x72   : > { %453 = vst [vmem:[#allocation2 + $0x28] sm:$0xf] %v452_v55  ;;  %p2680_p6 = scmp.ne.s32.totalorder %s2678_s20, %s2679_s29  ;;  %p2685_p4 = scmp.lt.s32.totalorder %s2683_s16, %s2679_s29 }
  0x73   : > { %2399 = vmatmul.msk.bf16.vlgmr.msra.gmra.mxu2 %vm752_vm5, %v931_v6  ;;  %v748_v14 = vpack.c.b16 %v741_v7, %v740_v3  ;;  %459 = vst [vmem:[#allocation2 + $0x30] sm:$0xf] %v458_v5 }
  0x74   : > { %450 = vst [vmem:[#allocation2 + $0x24] sm:$0x1] %v449_v10  ;;  %p2681_p13 = pnand %p2680_p6, %p2821_p11  ;;  %p2686_p5 = por %p2685_p4, %p2684_p3 }
  0x75   : > { %2366 = vmatmul.msk.bf16.vlgmr.msra.gmra.mxu0 %vm752_vm5, %v748_v14  ;;  %v2410_v15 = vld [vmem:[#allocation2 + $0x18] sm:$0xf]  ;;  %456 = vst [vmem:[#allocation2 + $0x2c] sm:$0x1] %v455_v23 }
  0x76   : > { %v2528_v21 = vld [vmem:[#allocation2 + $0x14] sm:$0xf0]  ;;  %v2532_v24 = vld [vmem:[#allocation2 + $0x1c] sm:$0xf0]  ;;  %465 = vst [vmem:[#allocation2 + $0x38] sm:$0xf] %v464_v45  ;;  %p2682_p2 = pneg %p2681_p13 }
  0x77   : > { %v865_v22 = vld [vmem:[#allocation2 + $0x18] sm:$0xe]  ;;  %v2377_v25 = vor.u32 %v2528_v21, %v2376_v17  ;;  %v2411_v29 = vor.u32 %v2532_v24, %v2410_v15  ;;  %v617_v31 = vld [vmem:[#allocation2 + $0x14] sm:$0x1]  ;;  %v610_v57 = vld [vmem:[#allocation2 + $0x20] sm:$0xf] }
  0x78   : > { %v609_v26 = vld [vmem:[#allocation2 + $0x18] sm:$0xf]  ;;  %v2394_v32 = vrot.slane %v865_v22, 9  ;;  %v618_v30 = vld [vmem:[#allocation2 + $0x1c] sm:$0x1]  ;;  %v901_v35 = vrot.slane %v617_v31, 5  ;;  %p2687_p7 = pnand %p2686_p5, %p2682_p2 }
  0x79   : > { %v671_v33 = vshrl.u32 %v609_v26, 16  ;;  %v674_v34 = vshll.u32 %v609_v26, 16  ;;  %2387 = vmatmul.msk.bf16.gmra.mxu1 %vm752_vm5, %v2377_v25  ;;  %v666_v37 = vshll.u32 %v617_v31, 16  ;;  %2421 = vmatmul.msk.bf16.gmra.mxu3 %vm752_vm5, %v2411_v29  ;;  %v905_v38 = vrot.slane %v618_v30, 5  ;;  %v611_v58 = vld [vmem:[#allocation2 + $0x28] sm:$0xf] }
  0x7a   : > { %v680_v41 = vshll.u32 %v618_v30, 16  ;;  %v902_v42 = vsel %vm3069_vm12, %v2393_v18, %v901_v35  ;;  %v2380_v60 = vld [vmem:[#allocation2 + $0x20] sm:$0xf]  ;;  %v2529_v63 = vld [vmem:[#allocation2 + $0x24] sm:$0xf0]  ;;  %v685_v55 = vshrl.u32 %v610_v57, 16 }
  0x7b   : > { %v673_v39 = vrot.slane %v671_v33, 4  ;;  %v676_v40 = vrot.slane %v674_v34, 5  ;;  %v668_v43 = vrot.slane %v666_v37, 5  ;;  %v906_v48 = vsel %vm3069_vm12, %v2394_v32, %v905_v38  ;;  %v619_v0 = vld [vmem:[#allocation2 + $0x24] sm:$0x1] }
  0x7c   : > { %v925_v49 = vunpack.c.l.b16 %v902_v42  ;;  %v682_v51 = vrot.slane %v680_v41, 5  ;;  %v926_v54 = vunpack.c.l.b16 %v906_v48  ;;  %v688_v1 = vshll.u32 %v610_v57, 16  ;;  %v866_v5 = vld [vmem:[#allocation2 + $0x20] sm:$0xe]  ;;  %v867_v6 = vld [vmem:[#allocation2 + $0x28] sm:$0xe] }
  0x7d   : > { %v677_v50 = vor.u32 %v676_v40, %v673_v39  ;;  %v669_v56 = vsel %vm3084_vm13, %v664_v19, %v668_v43  ;;  %v699_v7 = vshrl.u32 %v611_v58, 16  ;;  %v2414_v9 = vld [vmem:[#allocation2 + $0x28] sm:$0xf]  ;;  %v620_v10 = vld [vmem:[#allocation2 + $0x2c] sm:$0x1]  ;;  %v687_v11 = vrot.slane %v685_v55, 4 }
  0x7e   : > { %v742_v62 = vunpack.c.l.b16 %v669_v56  ;;  %v932_v3 = vpack.c.b16 %v926_v54, %v925_v49  ;;  %v694_v12 = vshll.u32 %v619_v0, 16  ;;  %462 = vst [vmem:[#allocation2 + $0x34] sm:$0x1] %v461_v61  ;;  %v690_v13 = vrot.slane %v688_v1, 5  ;;  %v2533_v19 = vld [vmem:[#allocation2 + $0x2c] sm:$0xf0] }
  0x7f   : > { %v678_v59 = vrot.slane %v677_v50, 4  ;;  %v701_v14 = vrot.slane %v699_v7, 4  ;;  %v702_v17 = vshll.u32 %v611_v58, 16  ;;  %468 = vst [vmem:[#allocation2 + $0x3c] sm:$0x1] %v467_v2  ;;  %v2381_v20 = vor.u32 %v2529_v63, %v2380_v60 }
  0x80   : > { %v2395_v15 = vrot.slane %v866_v5, 9  ;;  %v708_v21 = vshll.u32 %v620_v10, 16  ;;  %v612_v22 = vld [vmem:[#allocation2 + $0x30] sm:$0xf]  ;;  %v909_v23 = vrot.slane %v619_v0, 5  ;;  %v691_v24 = vor.u32 %v690_v13, %v687_v11 }
  0x81   : > { %v683_v4 = vsel %vm3084_vm13, %v678_v59, %v682_v51  ;;  %v704_v25 = vrot.slane %v702_v17, 5  ;;  %v713_v26 = vshrl.u32 %v612_v22, 16  ;;  %v2396_v28 = vrot.slane %v867_v6, 9  ;;  %v613_v37 = vld [vmem:[#allocation2 + $0x38] sm:$0xf] }
  0x82   : > { %v743_v8 = vunpack.c.l.b16 %v683_v4  ;;  %v913_v29 = vrot.slane %v620_v10, 5  ;;  %v696_v31 = vrot.slane %v694_v12, 5  ;;  %v716_v32 = vshll.u32 %v612_v22, 16  ;;  %v868_v49 = vld [vmem:[#allocation2 + $0x30] sm:$0xe] }
  0x83   : > { %2400 = vmatmul.msk.bf16.gmra.mxu2 %vm752_vm5, %v932_v3  ;;  %v2415_v33 = vor.u32 %v2533_v19, %v2414_v9  ;;  %v692_v34 = vrot.slane %v691_v24, 4  ;;  %v705_v30 = vor.u32 %v704_v25, %v701_v14  ;;  %v710_v35 = vrot.slane %v708_v21, 5  ;;  %v869_v50 = vld [vmem:[#allocation2 + $0x38] sm:$0xe]  ;;  %v1468_v55 = vld [vmem:[#allocation3] sm:$0xf] }
  0x84   : > { %v749_v18 = vpack.c.b16 %v743_v8, %v742_v62  ;;  %v715_v38 = vrot.slane %v713_v26, 4  ;;  %v718_v39 = vrot.slane %v716_v32, 5  ;;  %v478_v40 = vshrl.u32 %v469_v27, 16  ;;  %v558_v5 = vld [vmem:[#allocation3 + $0x8] sm:$0xf] }
  0x85   : > { %v910_v41 = vsel %vm3069_vm12, %v2395_v15, %v909_v23  ;;  %v706_v42 = vrot.slane %v705_v30, 4  ;;  %v727_v43 = vshrl.u32 %v613_v37, 16  ;;  %v730_v44 = vshll.u32 %v613_v37, 16  ;;  %v621_v48 = vld [vmem:[#allocation2 + $0x34] sm:$0x1] }
  0x86   : > { %2367 = vmatmul.msk.bf16.gmra.mxu0 %vm752_vm5, %v749_v18  ;;  %v914_v45 = vsel %vm3069_vm12, %v2396_v28, %v913_v29  ;;  %v697_v47 = vsel %vm3084_vm13, %v692_v34, %v696_v31  ;;  %v622_v53 = vld [vmem:[#allocation2 + $0x3c] sm:$0x1]  ;;  %v719_v54 = vor.u32 %v718_v39, %v715_v38  ;;  %v927_v58 = vunpack.c.l.b16 %v910_v41  ;;  %v561_v6 = vld [vmem:[#allocation3 + $0xc] sm:$0x1]  ;;  %v3148_v7 = vld [vmem:[#allocation2 + $0x30] sm:$0xf] }
  0x87   : > { %v711_v51 = vsel %vm3084_vm13, %v706_v42, %v710_v35  ;;  %v729_v56 = vrot.slane %v727_v43, 4  ;;  %v732_v57 = vrot.slane %v730_v44, 5  ;;  %v722_v59 = vshll.u32 %v621_v48, 16  ;;  %v3150_v8 = vld [vmem:[#allocation2 + $0x34] sm:$0xf0] }
  0x88   : > { %v480_v60 = vrot.slane %v478_v40, 7  ;;  %v928_v61 = vunpack.c.l.b16 %v914_v45  ;;  %v2397_v62 = vrot.slane %v868_v49, 9  ;;  %v917_v63 = vrot.slane %v621_v48, 5  ;;  %v3152_v13 = vld [vmem:[#allocation3 + $0x4] sm:$0x1] }
  0x89   : > { %2388 = vmatmul.msk.bf16.gmra.mxu1 %vm752_vm5, %v2381_v20  ;;  %2422 = vmatmul.msk.bf16.gmra.mxu3 %vm752_vm5, %v2415_v33  ;;  %v2398_v0 = vrot.slane %v869_v50, 9  ;;  %v744_v1 = vunpack.c.l.b16 %v697_v47  ;;  %v745_v2 = vunpack.c.l.b16 %v711_v51  ;;  %v921_v3 = vrot.slane %v622_v53, 5  ;;  %v3154_v20 = vld [vmem:[#allocation2 + $0xc] sm:$0x1]  ;;  %v3160_v23 = vld [vmem:[#allocation2 + $0x14] sm:$0x1] }
  0x8a   : > { %v481_v4 = vshll.u32 %v469_v27, 16  ;;  %v720_v9 = vrot.slane %v719_v54, 4  ;;  %v733_v10 = vor.u32 %v732_v57, %v729_v56  ;;  %v736_v11 = vshll.u32 %v622_v53, 16  ;;  %v1264_v24 = vld [vmem:[#allocation2 + $0x8] sm:$0xe] }
  0x8b   : > { %v484_v12 = vrot.slane %v480_v60, 4  ;;  %v724_v14 = vrot.slane %v722_v59, 5  ;;  %v1487_v18 = vshrl.u32 %v1468_v55, 16  ;;  %v1490_v19 = vshll.u32 %v1468_v55, 16  ;;  %v1070_v25 = vld [vmem:[#allocation2 + $0x8] sm:$0xf] }
  0x8c   : > { %v483_v17 = vor.u32 %v481_v4, %v480_v60  ;;  %v933_v15 = vpack.c.b16 %v928_v61, %v927_v58  ;;  %v918_v21 = vsel %vm3069_vm12, %v2397_v62, %v917_v63  ;;  %v2418_v26 = vld [vmem:[#allocation2 + $0x38] sm:$0xf]  ;;  %v2534_v27 = vld [vmem:[#allocation2 + $0x3c] sm:$0xf0]  ;;  %v922_v28 = vsel %vm3069_vm12, %v2398_v0, %v921_v3  ;;  %v1265_v33 = vld [vmem:[#allocation2 + $0x10] sm:$0xe] }
  0x8d   : > { %v562_v22 = vsel %vm3022_vm7, %v484_v12, %v561_v6  ;;  %v1489_v31 = vrot.slane %v1487_v18, 4  ;;  %v1492_v32 = vrot.slane %v1490_v19, 5  ;;  %v750_v34 = vpack.c.b16 %v745_v2, %v744_v1  ;;  %v1072_v41 = vld [vmem:[#allocation2 + $0x10] sm:$0xf]  ;;  %v2502_v47 = vld [vmem:[%s3632_s2 + $0x28] sm:$0xf] }
  0x8e   : > { %v559_v29 = vsel %vm2948_vm3, %v483_v17, %v558_v5  ;;  %563 = vst [vmem:[#allocation3 + $0xc] sm:$0x1] %v562_v22  ;;  %v734_v30 = vrot.slane %v733_v10, 4  ;;  %v738_v35 = vrot.slane %v736_v11, 5  ;;  %v1496_v37 = vshll.u32 %v3152_v13, 16 }
  0x8f   : > { %560 = vst [vmem:[#allocation3 + $0x8] sm:$0xf] %v559_v29  ;;  %v2385_v38 = vor.u32 %v3150_v8, %v3148_v7  ;;  %v2430_v39 = vrot.slane %v1264_v24, 9  ;;  %v1292_v40 = vrot.slane %v3154_v20, 5  ;;  %v1089_v42 = vshrl.u32 %v1070_v25, 16 }
  0x90   : > { %v929_v43 = vunpack.c.l.b16 %v918_v21  ;;  %v2431_v44 = vrot.slane %v1265_v33, 9  ;;  %v1296_v45 = vrot.slane %v3160_v23, 5  ;;  %v1092_v48 = vshll.u32 %v1070_v25, 16  ;;  %v2468_v59 = vld [vmem:[%s3632_s2 + $0x20] sm:$0xf] }
  0x91   : > { %v930_v49 = vunpack.c.l.b16 %v922_v28  ;;  %v725_v50 = vsel %vm3084_vm13, %v720_v9, %v724_v14  ;;  %v1493_v51 = vor.u32 %v1492_v32, %v1489_v31  ;;  %v2021_v53 = vsel %vm765_vm1, %v2502_v47, 0  ;;  %v2507_v4 = vld [vmem:[%s3632_s2 + $0x2c] sm:$0xf]  ;;  %v2481_v10 = vld [vmem:[%s3632_s2 + $0x24] sm:$0xf] }
  0x92   : > { %v2419_v54 = vor.u32 %v2534_v27, %v2418_v26  ;;  %v739_v56 = vsel %vm3084_vm13, %v734_v30, %v738_v35  ;;  %v1498_v57 = vrot.slane %v1496_v37, 5  ;;  %2030 = vmatpush.bf16.msra.mxu2 %v2021_v53  ;;  %v1103_v58 = vshrl.u32 %v1072_v41, 16  ;;  %v470_v18 = vld [vmem:[%s2906_s24 + $0x4] sm:$0xf]  ;;  %v471_v22 = vld [vmem:[%s2906_s24 + $0x8] sm:$0xf] }
  0x93   : > { %2401 = vmatmul.msk.bf16.gmra.mxu2 %vm752_vm5, %v933_v15  ;;  %v1293_v60 = vsel %vm3069_vm12, %v2430_v39, %v1292_v40  ;;  %v1091_v61 = vrot.slane %v1089_v42, 4  ;;  %v1094_v62 = vrot.slane %v1092_v48, 5  ;;  %v1106_v63 = vshll.u32 %v1072_v41, 16  ;;  %v564_v37 = vld [vmem:[#allocation3 + $0x10] sm:$0xf] }
  0x94   : > { %v3186_v0 = vunpack.c.l.b16 %v725_v50  ;;  %v1297_v1 = vsel %vm3069_vm12, %v2431_v44, %v1296_v45  ;;  %v1098_v2 = vshll.u32 %v3154_v20, 16  ;;  %v1745_v3 = vsel %vm765_vm1, %v2468_v59, 0  ;;  %v1074_v39 = vld [vmem:[#allocation2 + $0x18] sm:$0xf] }
  0x95   : > { %v3188_v55 = vld [vmem:[#allocation3 + $0xc] sm:$0x1]  ;;  %v3198_v5 = vpack.c.b16 %v930_v49, %v929_v43  ;;  %v3200_v6 = vunpack.c.l.b16 %v739_v56  ;;  %v1494_v8 = vrot.slane %v1493_v51, 4  ;;  %1754 = vmatpush.bf16.msra.mxu0 %v1745_v3  ;;  %v1322_v14 = vunpack.c.l.b16 %v1293_v60  ;;  %v570_v43 = vld [vmem:[#allocation3 + $0x18] sm:$0xf] }
  0x96   : > { %2368 = vmatmul.msk.bf16.gmra.mxu0 %vm752_vm5, %v750_v34  ;;  %v1470_v7 = vld [vmem:[#allocation3 + $0x8] sm:$0xf]  ;;  %v1510_v9 = vshll.u32 %v3188_v55, 16  ;;  %v1105_v17 = vrot.slane %v1103_v58, 4  ;;  %v1323_v19 = vunpack.c.l.b16 %v1297_v1  ;;  %v1095_v20 = vor.u32 %v1094_v62, %v1091_v61  ;;  %v573_v49 = vld [vmem:[#allocation3 + $0x1c] sm:$0x1] }
  0x97   : > { %v1501_v11 = vshrl.u32 %v1470_v7, 16  ;;  %v1504_v12 = vshll.u32 %v1470_v7, 16  ;;  %v1108_v15 = vrot.slane %v1106_v63, 5  ;;  %v2143_v21 = vsel %vm765_vm1, %v2507_v4, 0  ;;  %v1266_v56 = vld [vmem:[#allocation2 + $0x18] sm:$0xe] }
  0x98   : > { %v1112_v26 = vshll.u32 %v3160_v23, 16  ;;  %2152 = vmatpush.bf16.msra.mxu3 %v2143_v21  ;;  %v1827_v27 = vsel %vm765_vm1, %v2481_v10, 0  ;;  %v1499_v28 = vsel %vm3084_vm13, %v1494_v8, %v1498_v57  ;;  %v1512_v29 = vrot.slane %v1510_v9, 5  ;;  %v3218_v62 = vld [vmem:[#allocation2 + $0x24] sm:$0x1] }
  0x99   : > { %2389 = vmatmul.msk.bf16.gmra.mxu1 %vm752_vm5, %v2385_v38  ;;  %2423 = vmatmul.msk.bf16.gmra.mxu3 %vm752_vm5, %v2419_v54  ;;  %v1503_v24 = vrot.slane %v1501_v11, 4  ;;  %v1506_v25 = vrot.slane %v1504_v12, 5  ;;  %v486_v31 = vshrl.u32 %v470_v18, 16  ;;  %v489_v32 = vshll.u32 %v470_v18, 16  ;;  %v567_v38 = vld [vmem:[#allocation3 + $0x14] sm:$0x1] }
  0x9a   : > { %1836 = vmatpush.bf16.msra.mxu1 %v1827_v27  ;;  %v1109_v34 = vor.u32 %v1108_v15, %v1105_v17  ;;  %v494_v30 = vshrl.u32 %v471_v22, 16  ;;  %v497_v35 = vshll.u32 %v471_v22, 16  ;;  %v751_v23 = vpack.c.b16 %v3200_v6, %v3186_v0  ;;  %v1075_v54 = vld [vmem:[#allocation2 + $0x1c] sm:$0x1]  ;;  %v1267_v63 = vld [vmem:[#allocation2 + $0x20] sm:$0xe] }
  0x9b   : > { %v1507_v33 = vor.u32 %v1506_v25, %v1503_v24  ;;  %v1096_v40 = vrot.slane %v1095_v20, 4  ;;  %v1100_v41 = vrot.slane %v1098_v2, 5  ;;  %v488_v42 = vrot.slane %v486_v31, 7  ;;  %v3220_v1 = vld [vmem:[#allocation3] sm:$0xf] }
  0x9c   : > { %v1598_v45 = vunpack.c.l.b16 %v1499_v28  ;;  %v1114_v47 = vrot.slane %v1112_v26, 5  ;;  %v496_v48 = vrot.slane %v494_v30, 7  ;;  %v1330_v50 = vpack.c.b16 %v1323_v19, %v1322_v14  ;;  %v1076_v6 = vld [vmem:[#allocation2 + $0x20] sm:$0xf]  ;;  %v472_v7 = vld [vmem:[%s2906_s24 + $0xc] sm:$0xf] }
  0x9d   : > { %v1508_v44 = vrot.slane %v1507_v33, 4  ;;  %v491_v51 = vor.u32 %v489_v32, %v488_v42  ;;  %v492_v53 = vrot.slane %v488_v42, 4  ;;  %v1117_v57 = vshrl.u32 %v1074_v39, 16  ;;  %v3231_v8 = vld [vmem:[#allocation3 + $0x4] sm:$0xf0] }
  0x9e   : > { %v1110_v59 = vrot.slane %v1109_v34, 4  ;;  %v499_v60 = vor.u32 %v497_v35, %v496_v48  ;;  %v500_v61 = vrot.slane %v496_v48, 4  ;;  %v1101_v2 = vsel %vm3084_vm13, %v1096_v40, %v1100_v41  ;;  %v473_v22 = vld [vmem:[%s2906_s24 + $0x10] sm:$0xf]  ;;  %v579_v40 = vld [vmem:[#allocation3 + $0x24] sm:$0x1] }
  0x9f   : > { %v1513_v58 = vsel %vm3084_vm13, %v1508_v44, %v1512_v29  ;;  %v565_v3 = vsel %vm2948_vm3, %v491_v51, %v564_v37  ;;  %v568_v4 = vsel %vm3022_vm7, %v492_v53, %v567_v38  ;;  %v2432_v11 = vrot.slane %v1266_v56, 9 }
  0xa0   : > { %v1599_v0 = vunpack.c.l.b16 %v1513_v58  ;;  %566 = vst [vmem:[#allocation3 + $0x10] sm:$0xf] %v565_v3  ;;  %v571_v9 = vsel %vm2948_vm3, %v499_v60, %v570_v43  ;;  %v574_v10 = vsel %vm3022_vm7, %v500_v61, %v573_v49  ;;  %v1300_v12 = vrot.slane %v1075_v54, 5 }
  0xa1   : > { %569 = vst [vmem:[#allocation3 + $0x14] sm:$0x1] %v568_v4  ;;  %v2433_v14 = vrot.slane %v1267_v63, 9  ;;  %v1304_v17 = vrot.slane %v3218_v62, 5  ;;  %v1119_v18 = vrot.slane %v1117_v57, 4  ;;  %v1120_v19 = vshll.u32 %v1074_v39, 16 }
  0xa2   : > { %v1115_v20 = vsel %vm3084_vm13, %v1110_v59, %v1114_v47  ;;  %572 = vst [vmem:[#allocation3 + $0x18] sm:$0xf] %v571_v9  ;;  %v1131_v15 = vshrl.u32 %v1076_v6, 16  ;;  %v1134_v21 = vshll.u32 %v1076_v6, 16  ;;  %v1126_v25 = vshll.u32 %v1075_v54, 16 }
  0xa3   : > { %2402 = vmatmul.msk.bf16.gmra.mxu2 %vm752_vm5, %v3198_v5  ;;  %v1606_v5 = vpack.c.b16 %v1599_v0, %v1598_v45  ;;  %575 = vst [vmem:[#allocation3 + $0x1c] sm:$0x1] %v574_v10  ;;  %v1122_v24 = vrot.slane %v1120_v19, 5  ;;  %v502_v26 = vshrl.u32 %v472_v7, 16  ;;  %v505_v27 = vshll.u32 %v472_v7, 16 }
  0xa4   : > { %v2446_v28 = vor.u32 %v3231_v8, %v3220_v1  ;;  %v1133_v29 = vrot.slane %v1131_v15, 4  ;;  %v1136_v31 = vrot.slane %v1134_v21, 5  ;;  %v3245_v32 = vunpack.c.l.b16 %v1101_v2  ;;  %v582_v0 = vld [vmem:[#allocation3 + $0x28] sm:$0xf]  ;;  %v585_v1 = vld [vmem:[#allocation3 + $0x2c] sm:$0x1] }
  0xa5   : > { %v1123_v33 = vor.u32 %v1122_v24, %v1119_v18  ;;  %v504_v34 = vrot.slane %v502_v26, 7  ;;  %v510_v30 = vshrl.u32 %v473_v22, 16  ;;  %v3248_v35 = vunpack.c.l.b16 %v1115_v20  ;;  %v3265_v2 = vld [vmem:[%s2906_s24 + $0x14] sm:$0xf]  ;;  %v1078_v26 = vld [vmem:[#allocation2 + $0x28] sm:$0xf] }
  0xa6   : > { %2369 = vmatmul.msk.bf16.gmra.mxu0 %vm752_vm5, %v751_v23  ;;  %v1301_v37 = vsel %vm3069_vm12, %v2432_v11, %v1300_v12  ;;  %v1305_v38 = vsel %vm3069_vm12, %v2433_v14, %v1304_v17  ;;  %v1140_v39 = vshll.u32 %v3218_v62, 16  ;;  %v576_v23 = vld [vmem:[#allocation3 + $0x20] sm:$0xf]  ;;  %v1128_v42 = vrot.slane %v1126_v25, 5 }
  0xa7   : > { %v1472_v41 = vld [vmem:[#allocation3 + $0x10] sm:$0xf]  ;;  %v1137_v43 = vor.u32 %v1136_v31, %v1133_v29  ;;  %v507_v44 = vor.u32 %v505_v27, %v504_v34  ;;  %v508_v45 = vrot.slane %v504_v34, 4  ;;  %v513_v51 = vshll.u32 %v473_v22, 16  ;;  %v1268_v25 = vld [vmem:[#allocation2 + $0x28] sm:$0xe] }
  0xa8   : > { %v3255_v47 = vld [vmem:[#allocation3 + $0x14] sm:$0x1]  ;;  %v1515_v48 = vshrl.u32 %v1472_v41, 16  ;;  %v1518_v49 = vshll.u32 %v1472_v41, 16  ;;  %v512_v56 = vrot.slane %v510_v30, 7  ;;  %v1208_v3 = vpack.c.b16 %v3248_v35, %v3245_v32 }
  0xa9   : > { %2438 = vmatmul.msk.bf16.vlgmr.msrb.gmra.mxu1 %vm752_vm5, %v1330_v50  ;;  %2464 = vmatmul.msk.bf16.vlgmr.msrb.gmra.mxu3 %vm752_vm5, %v1606_v5  ;;  %v1124_v50 = vrot.slane %v1123_v33, 4  ;;  %v1474_v53 = vld [vmem:[#allocation3 + $0x18] sm:$0xf]  ;;  %v1524_v54 = vshll.u32 %v3255_v47, 16  ;;  %v577_v57 = vsel %vm2948_vm3, %v507_v44, %v576_v23  ;;  %v580_v58 = vsel %vm3022_vm7, %v508_v45, %v579_v40  ;;  %v3282_v32 = vld [vmem:[#allocation2 + $0x2c] sm:$0x1] }
  0xaa   : > { %v3262_v59 = vld [vmem:[#allocation3 + $0x1c] sm:$0x1]  ;;  %v1517_v60 = vrot.slane %v1515_v48, 4  ;;  %v1520_v61 = vrot.slane %v1518_v49, 5  ;;  %v1529_v62 = vshrl.u32 %v1474_v53, 16  ;;  %v1532_v63 = vshll.u32 %v1474_v53, 16 }
  0xab   : > { %v1538_v4 = vshll.u32 %v3262_v59, 16  ;;  %v1138_v6 = vrot.slane %v1137_v43, 4  ;;  %v1142_v7 = vrot.slane %v1140_v39, 5  ;;  %578 = vst [vmem:[#allocation3 + $0x20] sm:$0xf] %v577_v57  ;;  %v1526_v9 = vrot.slane %v1524_v54, 5 }
  0xac   : > { %v1521_v8 = vor.u32 %v1520_v61, %v1517_v60  ;;  %v1531_v10 = vrot.slane %v1529_v62, 4  ;;  %v1534_v11 = vrot.slane %v1532_v63, 5  ;;  %581 = vst [vmem:[#allocation3 + $0x24] sm:$0x1] %v580_v58  ;;  %v1324_v12 = vunpack.c.l.b16 %v1301_v37  ;;  %v3285_v35 = vld [vmem:[#allocation3 + $0x10] sm:$0xf] }
  0xad   : > { %v1325_v14 = vunpack.c.l.b16 %v1305_v38  ;;  %v515_v17 = vor.u32 %v513_v51, %v512_v56  ;;  %v516_v18 = vrot.slane %v512_v56, 4  ;;  %v1540_v20 = vrot.slane %v1538_v4, 5  ;;  %v3287_v37 = vld [vmem:[#allocation3 + $0x14] sm:$0xf0]  ;;  %v3291_v39 = vld [vmem:[#allocation2 + $0x34] sm:$0x1] }
  0xae   : > { %v1522_v19 = vrot.slane %v1521_v8, 4  ;;  %v1535_v5 = vor.u32 %v1534_v11, %v1531_v10  ;;  %v1129_v15 = vsel %vm3084_vm13, %v1124_v50, %v1128_v42  ;;  %v1143_v21 = vsel %vm3084_vm13, %v1138_v6, %v1142_v7  ;;  %v3294_v23 = vld [vmem:[%s2906_s24 + $0x18] sm:$0xf]  ;;  %v1080_v44 = vld [vmem:[#allocation2 + $0x30] sm:$0xf] }
  0xaf   : > { %v583_v22 = vsel %vm2948_vm3, %v515_v17, %v582_v0  ;;  %v586_v24 = vsel %vm3022_vm7, %v516_v18, %v585_v1  ;;  %v518_v27 = vshrl.u32 %v3265_v2, 16  ;;  %v521_v33 = vshll.u32 %v3265_v2, 16 }
  0xb0   : > { %v1527_v29 = vsel %vm3084_vm13, %v1522_v19, %v1526_v9  ;;  %v1536_v31 = vrot.slane %v1535_v5, 4  ;;  %584 = vst [vmem:[#allocation3 + $0x28] sm:$0xf] %v583_v22  ;;  %v1331_v30 = vpack.c.b16 %v1325_v14, %v1324_v12  ;;  %v3289_v38 = vunpack.c.l.b16 %v1129_v15 }
  0xb1   : > { %v1600_v34 = vunpack.c.l.b16 %v1527_v29  ;;  %587 = vst [vmem:[#allocation3 + $0x2c] sm:$0x1] %v586_v24  ;;  %v3299_v41 = vunpack.c.l.b16 %v1143_v21  ;;  %v2434_v43 = vrot.slane %v1268_v25, 9  ;;  %v1145_v45 = vshrl.u32 %v1078_v26, 16  ;;  %v588_v25 = vld [vmem:[#allocation3 + $0x30] sm:$0xf] }
  0xb2   : > { %v1541_v40 = vsel %vm3084_vm13, %v1536_v31, %v1540_v20  ;;  %v1476_v42 = vld [vmem:[#allocation3 + $0x20] sm:$0xf]  ;;  %v1148_v53 = vshll.u32 %v1078_v26, 16  ;;  %v1308_v56 = vrot.slane %v3282_v32, 5  ;;  %v1312_v58 = vrot.slane %v3291_v39, 5 }
  0xb3   : > { %2459 = vmatmul.msk.bf16.vlgmr.msrb.gmra.mxu2 %vm752_vm5, %v2446_v28  ;;  %v1269_v28 = vld [vmem:[#allocation2 + $0x30] sm:$0xe]  ;;  %v1601_v48 = vunpack.c.l.b16 %v1541_v40  ;;  %v3301_v49 = vld [vmem:[#allocation3 + $0x24] sm:$0x1]  ;;  %v1543_v50 = vshrl.u32 %v1476_v42, 16  ;;  %v1546_v51 = vshll.u32 %v1476_v42, 16  ;;  %v2450_v0 = vor.u32 %v3287_v37, %v3285_v35 }
  0xb4   : > { %v1552_v54 = vshll.u32 %v3301_v49, 16  ;;  %v2435_v57 = vrot.slane %v1269_v28, 9  ;;  %v1159_v63 = vshrl.u32 %v1080_v44, 16  ;;  %v1147_v1 = vrot.slane %v1145_v45, 4  ;;  %v597_v42 = vld [vmem:[#allocation3 + $0x3c] sm:$0x1] }
  0xb5   : > { %v1607_v60 = vpack.c.b16 %v1601_v48, %v1600_v34  ;;  %v1545_v61 = vrot.slane %v1543_v50, 4  ;;  %v1548_v62 = vrot.slane %v1546_v51, 5  ;;  %v1162_v2 = vshll.u32 %v1080_v44, 16  ;;  %v591_v34 = vld [vmem:[#allocation3 + $0x34] sm:$0x1] }
  0xb6   : > { %2425 = vmatmul.msk.bf16.vlgmr.msrb.gmra.mxu0 %vm752_vm5, %v1208_v3  ;;  %v526_v3 = vshrl.u32 %v3294_v23, 16  ;;  %v1554_v7 = vrot.slane %v1552_v54, 5  ;;  %v1150_v8 = vrot.slane %v1148_v53, 5  ;;  %v520_v9 = vrot.slane %v518_v27, 7  ;;  %v594_v48 = vld [vmem:[#allocation3 + $0x38] sm:$0xf] }
  0xb7   : > { %v1478_v4 = vld [vmem:[#allocation3 + $0x28] sm:$0xf]  ;;  %v1549_v6 = vor.u32 %v1548_v62, %v1545_v61  ;;  %v1209_v10 = vpack.c.b16 %v3299_v41, %v3289_v38  ;;  %v1309_v17 = vsel %vm3069_vm12, %v2434_v43, %v1308_v56  ;;  %v1313_v5 = vsel %vm3069_vm12, %v2435_v57, %v1312_v58  ;;  %v3334_v56 = vld [vmem:[#allocation2 + $0x3c] sm:$0x1]  ;;  %v3338_v61 = vld [vmem:[#allocation2 + $0x44] sm:$0x1] }
  0xb8   : > { %v3313_v11 = vld [vmem:[#allocation3 + $0x2c] sm:$0x1]  ;;  %v1557_v12 = vshrl.u32 %v1478_v4, 16  ;;  %v1560_v14 = vshll.u32 %v1478_v4, 16  ;;  %v1161_v20 = vrot.slane %v1159_v63, 4  ;;  %v1164_v22 = vrot.slane %v1162_v2, 5 }
  0xb9   : > { %2439 = vmatmul.msk.bf16.gmra.mxu1 %vm752_vm5, %v1331_v30  ;;  %2465 = vmatmul.msk.bf16.gmra.mxu3 %vm752_vm5, %v1607_v60  ;;  %v1550_v18 = vrot.slane %v1549_v6, 4  ;;  %v1566_v19 = vshll.u32 %v3313_v11, 16  ;;  %v523_v24 = vor.u32 %v521_v33, %v520_v9  ;;  %v1326_v27 = vunpack.c.l.b16 %v1309_v17  ;;  %v1270_v62 = vld [vmem:[#allocation2 + $0x38] sm:$0xe]  ;;  %v1084_v6 = vld [vmem:[#allocation2 + $0x40] sm:$0xf] }
  0xba   : > { %v1559_v15 = vrot.slane %v1557_v12, 4  ;;  %v1562_v21 = vrot.slane %v1560_v14, 5  ;;  %v1151_v29 = vor.u32 %v1150_v8, %v1147_v1  ;;  %v1154_v31 = vshll.u32 %v3282_v32, 16  ;;  %v1271_v1 = vld [vmem:[#allocation2 + $0x40] sm:$0xe] }
  0xbb   : > { %v1555_v26 = vsel %vm3084_vm13, %v1550_v18, %v1554_v7  ;;  %v1568_v35 = vrot.slane %v1566_v19, 5  ;;  %v524_v37 = vrot.slane %v520_v9, 4  ;;  %v528_v38 = vrot.slane %v526_v3, 7  ;;  %v1082_v3 = vld [vmem:[#allocation2 + $0x38] sm:$0xf] }
  0xbc   : > { %v1563_v30 = vor.u32 %v1562_v21, %v1559_v15  ;;  %v1327_v28 = vunpack.c.l.b16 %v1313_v5  ;;  %v1168_v40 = vshll.u32 %v3291_v39, 16  ;;  %v529_v41 = vshll.u32 %v3294_v23, 16 }
  0xbd   : > { %v589_v33 = vsel %vm2948_vm3, %v523_v24, %v588_v25  ;;  %v1165_v44 = vor.u32 %v1164_v22, %v1161_v20  ;;  %v532_v45 = vrot.slane %v528_v38, 4  ;;  %v592_v32 = vsel %vm3022_vm7, %v524_v37, %v591_v34  ;;  %v2453_v24 = vld [vmem:[#allocation3 + $0x20] sm:$0xf] }
  0xbe   : > { %v1564_v43 = vrot.slane %v1563_v30, 4  ;;  %590 = vst [vmem:[#allocation3 + $0x30] sm:$0xf] %v589_v33  ;;  %v1602_v50 = vunpack.c.l.b16 %v1555_v26  ;;  %v531_v51 = vor.u32 %v529_v41, %v528_v38  ;;  %v1152_v23 = vrot.slane %v1151_v29, 4 }
  0xbf   : > { %593 = vst [vmem:[#allocation3 + $0x34] sm:$0x1] %v592_v32  ;;  %v1156_v53 = vrot.slane %v1154_v31, 5  ;;  %v598_v54 = vsel %vm3022_vm7, %v532_v45, %v597_v42  ;;  %v1332_v58 = vpack.c.b16 %v1327_v28, %v1326_v27  ;;  %v1166_v63 = vrot.slane %v1165_v44, 4  ;;  %v2537_v31 = vld [vmem:[#allocation3 + $0x24] sm:$0xf0] }
  0xc0   : > { %v1569_v39 = vsel %vm3084_vm13, %v1564_v43, %v1568_v35  ;;  %v595_v60 = vsel %vm2948_vm3, %v531_v51, %v594_v48  ;;  %599 = vst [vmem:[#allocation3 + $0x3c] sm:$0x1] %v598_v54  ;;  %v2436_v8 = vrot.slane %v1270_v62, 9  ;;  %v1316_v9 = vrot.slane %v3334_v56, 5 }
  0xc1   : > { %v1603_v57 = vunpack.c.l.b16 %v1569_v39  ;;  %596 = vst [vmem:[#allocation3 + $0x38] sm:$0xf] %v595_v60  ;;  %v1157_v4 = vsel %vm3084_vm13, %v1152_v23, %v1156_v53  ;;  %v2437_v12 = vrot.slane %v1271_v1, 9  ;;  %v1320_v14 = vrot.slane %v3338_v61, 5  ;;  %v1662_v1 = vld [vmem:[#allocation3] sm:$0xe] }
  0xc2   : > { %v1173_v5 = vshrl.u32 %v1082_v3, 16  ;;  %v1176_v15 = vshll.u32 %v1082_v3, 16  ;;  %v1187_v21 = vshrl.u32 %v1084_v6, 16  ;;  %v1190_v22 = vshll.u32 %v1084_v6, 16 }
  0xc3   : > { %2460 = vmatmul.msk.bf16.gmra.mxu2 %vm752_vm5, %v2450_v0  ;;  %v1170_v0 = vrot.slane %v1168_v40, 5  ;;  %v1608_v2 = vpack.c.b16 %v1603_v57, %v1602_v50  ;;  %v1204_v25 = vunpack.c.l.b16 %v1157_v4  ;;  %v1317_v37 = vsel %vm3069_vm12, %v2436_v8, %v1316_v9  ;;  %v1663_v8 = vld [vmem:[#allocation3 + $0x8] sm:$0xe] }
  0xc4   : > { %v1321_v38 = vsel %vm3069_vm12, %v2437_v12, %v1320_v14  ;;  %v1175_v42 = vrot.slane %v1173_v5, 4  ;;  %v1178_v43 = vrot.slane %v1176_v15, 5  ;;  %v1189_v44 = vrot.slane %v1187_v21, 4  ;;  %v1868_v14 = vld [vmem:[#allocation3 + $0x10] sm:$0xf] }
  0xc5   : > { %v1480_v7 = vld [vmem:[#allocation3 + $0x30] sm:$0xf]  ;;  %v1192_v45 = vrot.slane %v1190_v22, 5  ;;  %v2454_v32 = vor.u32 %v2537_v31, %v2453_v24  ;;  %v1328_v23 = vunpack.c.l.b16 %v1317_v37  ;;  %v1329_v53 = vunpack.c.l.b16 %v1321_v38  ;;  %v2060_v5 = vld [vmem:[#allocation3 + $0x8] sm:$0xe] }
  0xc6   : > { %2426 = vmatmul.msk.bf16.gmra.mxu0 %vm752_vm5, %v1209_v10  ;;  %v1171_v10 = vsel %vm3084_vm13, %v1166_v63, %v1170_v0  ;;  %v3348_v17 = vld [vmem:[#allocation3 + $0x34] sm:$0x1]  ;;  %v1571_v18 = vshrl.u32 %v1480_v7, 16  ;;  %v1574_v19 = vshll.u32 %v1480_v7, 16  ;;  %v1182_v60 = vshll.u32 %v3334_v56, 16 }
  0xc7   : > { %v1580_v20 = vshll.u32 %v3348_v17, 16  ;;  %v3352_v26 = vld [vmem:[#allocation3 + $0x3c] sm:$0x1]  ;;  %v1205_v34 = vunpack.c.l.b16 %v1171_v10  ;;  %v1179_v62 = vor.u32 %v1178_v43, %v1175_v42  ;;  %v1193_v63 = vor.u32 %v1192_v45, %v1189_v44  ;;  %v1866_v7 = vld [vmem:[#allocation3 + $0x8] sm:$0xf] }
  0xc8   : > { %v1573_v27 = vrot.slane %v1571_v18, 4  ;;  %v1576_v29 = vrot.slane %v1574_v19, 5  ;;  %v1482_v30 = vld [vmem:[#allocation3 + $0x38] sm:$0xf]  ;;  %v1594_v33 = vshll.u32 %v3352_v26, 16  ;;  %v1196_v0 = vshll.u32 %v3338_v61, 16 }
  0xc9   : > { %2440 = vmatmul.msk.bf16.gmra.mxu1 %vm752_vm5, %v1332_v58  ;;  %2466 = vmatmul.msk.bf16.gmra.mxu3 %vm752_vm5, %v1608_v2  ;;  %v1582_v35 = vrot.slane %v1580_v20, 5  ;;  %v1585_v40 = vshrl.u32 %v1482_v30, 16  ;;  %v1588_v41 = vshll.u32 %v1482_v30, 16  ;;  %v1210_v39 = vpack.c.b16 %v1205_v34, %v1204_v25  ;;  %v1867_v20 = vld [vmem:[#allocation3 + $0xc] sm:$0x1] }
  0xca   : > { %v1577_v28 = vor.u32 %v1576_v29, %v1573_v27  ;;  %v1596_v58 = vrot.slane %v1594_v33, 5  ;;  %v1690_v2 = vrot.slane %v3152_v13, 5  ;;  %v1333_v6 = vpack.c.b16 %v1329_v53, %v1328_v23  ;;  %v1869_v25 = vld [vmem:[#allocation3 + $0x14] sm:$0x1]  ;;  %v2061_v27 = vld [vmem:[#allocation3 + $0x10] sm:$0xe] }
  0xcb   : > { %v1587_v50 = vrot.slane %v1585_v40, 4  ;;  %v1590_v51 = vrot.slane %v1588_v41, 5  ;;  %v1694_v9 = vrot.slane %v3188_v55, 5  ;;  %v1184_v12 = vrot.slane %v1182_v60, 5  ;;  %v2457_v44 = vld [vmem:[#allocation3 + $0x30] sm:$0xf] }
  0xcc   : > { %v1578_v48 = vrot.slane %v1577_v28, 4  ;;  %v2469_v61 = vrot.slane %v1662_v1, 9  ;;  %v1180_v18 = vrot.slane %v1179_v62, 4  ;;  %v1194_v13 = vrot.slane %v1193_v63, 4  ;;  %v2538_v45 = vld [vmem:[#allocation3 + $0x34] sm:$0xf0] }
  0xcd   : > { %v1591_v57 = vor.u32 %v1590_v51, %v1587_v50  ;;  %v1198_v19 = vrot.slane %v1196_v0, 5  ;;  %v1885_v15 = vshrl.u32 %v1866_v7, 16  ;;  %v1888_v21 = vshll.u32 %v1866_v7, 16  ;;  %v2484_v60 = vld [vmem:[#allocation3 + $0x8] sm:$0xf] }
  0xce   : > { %v1583_v54 = vsel %vm3084_vm13, %v1578_v48, %v1582_v35  ;;  %v1691_v22 = vsel %vm3069_vm12, %v2469_v61, %v1690_v2  ;;  %v2470_v55 = vrot.slane %v1663_v8, 9  ;;  %v1899_v29 = vshrl.u32 %v1868_v14, 16  ;;  %v1870_v61 = vld [vmem:[#allocation3 + $0x18] sm:$0xf] }
  0xcf   : > { %v1592_v3 = vrot.slane %v1591_v57, 4  ;;  %v1604_v4 = vunpack.c.l.b16 %v1583_v54  ;;  %v1902_v31 = vshll.u32 %v1868_v14, 16  ;;  %v1720_v34 = vunpack.c.l.b16 %v1691_v22 }
  0xd0   : > { %v2508_v30 = vrot.slane %v2060_v5, 9  ;;  %v1695_v35 = vsel %vm3069_vm12, %v2470_v55, %v1694_v9  ;;  %v1185_v37 = vsel %vm3084_vm13, %v1180_v18, %v1184_v12  ;;  %v1199_v38 = vsel %vm3084_vm13, %v1194_v13, %v1198_v19  ;;  %v2062_v55 = vld [vmem:[#allocation3 + $0x18] sm:$0xe] }
  0xd1   : > { %v1597_v56 = vsel %vm3084_vm13, %v1592_v3, %v1596_v58  ;;  %v2088_v28 = vrot.slane %v1867_v20, 5  ;;  %v1721_v40 = vunpack.c.l.b16 %v1695_v35  ;;  %v2509_v41 = vrot.slane %v2061_v27, 9  ;;  %v2539_v3 = vld [vmem:[#allocation3 + $0xc] sm:$0xf0] }
  0xd2   : > { %v1605_v10 = vunpack.c.l.b16 %v1597_v56  ;;  %v2092_v33 = vrot.slane %v1869_v25, 5  ;;  %v1887_v42 = vrot.slane %v1885_v15, 4  ;;  %v1890_v43 = vrot.slane %v1888_v21, 5  ;;  %v1872_v15 = vld [vmem:[#allocation3 + $0x20] sm:$0xf] }
  0xd3   : > { %2461 = vmatmul.msk.bf16.gmra.mxu2 %vm752_vm5, %v2454_v32  ;;  %v1901_v32 = vrot.slane %v1899_v29, 4  ;;  %v1904_v48 = vrot.slane %v1902_v31, 5  ;;  %v3379_v50 = vpack.c.b16 %v1721_v40, %v1720_v34  ;;  %v1206_v51 = vunpack.c.l.b16 %v1185_v37  ;;  %v1873_v31 = vld [vmem:[#allocation3 + $0x24] sm:$0x1]  ;;  %v2063_v34 = vld [vmem:[#allocation3 + $0x20] sm:$0xe] }
  0xd4   : > { %v1609_v24 = vpack.c.b16 %v1605_v10, %v1604_v4  ;;  %v2089_v23 = vsel %vm3069_vm12, %v2508_v30, %v2088_v28  ;;  %v2458_v53 = vor.u32 %v2538_v45, %v2457_v44  ;;  %v2093_v54 = vsel %vm3069_vm12, %v2509_v41, %v2092_v33  ;;  %v1664_v4 = vld [vmem:[#allocation3 + $0x10] sm:$0xe] }
  0xd5   : > { %v1891_v57 = vor.u32 %v1890_v43, %v1887_v42  ;;  %v1894_v58 = vshll.u32 %v1867_v20, 16  ;;  %v1905_v62 = vor.u32 %v1904_v48, %v1901_v32  ;;  %v1908_v63 = vshll.u32 %v1869_v25, 16  ;;  %v1871_v20 = vld [vmem:[#allocation3 + $0x1c] sm:$0x1] }
  0xd6   : > { %2427 = vmatmul.msk.bf16.gmra.mxu0 %vm752_vm5, %v1210_v39  ;;  %v1207_v39 = vunpack.c.l.b16 %v1199_v38  ;;  %v2118_v2 = vunpack.c.l.b16 %v2089_v23  ;;  %v2119_v7 = vunpack.c.l.b16 %v2093_v54  ;;  %v2471_v8 = vrot.slane %v1664_v4, 9 }
  0xd7   : > { %v1698_v9 = vrot.slane %v3255_v47, 5  ;;  %v1892_v12 = vrot.slane %v1891_v57, 4  ;;  %v1896_v14 = vrot.slane %v1894_v58, 5  ;;  %v1702_v10 = vrot.slane %v3262_v59, 5  ;;  %v476_v59 = vld [vmem:[%s2906_s24 + $0x1c] sm:$0xf] }
  0xd8   : > { %v1211_v0 = vpack.c.b16 %v1207_v39, %v1206_v51  ;;  %v2485_v18 = vor.u32 %v2539_v3, %v2484_v60  ;;  %v1906_v13 = vrot.slane %v1905_v62, 4  ;;  %v1910_v19 = vrot.slane %v1908_v63, 5  ;;  %v2488_v60 = vld [vmem:[#allocation3 + $0x18] sm:$0xf]  ;;  %v2540_v62 = vld [vmem:[#allocation3 + $0x1c] sm:$0xf0] }
  0xd9   : > { %2441 = vmatmul.msk.bf16.gmra.mxu1 %vm752_vm5, %v1333_v6  ;;  %2467 = vmatmul.msk.bf16.gmra.mxu3 %vm752_vm5, %v1609_v24  ;;  %v1665_v6 = vld [vmem:[#allocation3 + $0x18] sm:$0xe]  ;;  %v1699_v5 = vsel %vm3069_vm12, %v2471_v8, %v1698_v9  ;;  %v2126_v22 = vpack.c.b16 %v2119_v7, %v2118_v2  ;;  %v1913_v24 = vshrl.u32 %v1870_v61, 16  ;;  %v1916_v25 = vshll.u32 %v1870_v61, 16  ;;  %v600_v9 = vld [vmem:[#allocation3 + $0x40] sm:$0xf] }
  0xda   : > { %v2472_v56 = vrot.slane %v1665_v6, 9  ;;  %v1722_v21 = vunpack.c.l.b16 %v1699_v5  ;;  %v1897_v29 = vsel %vm3084_vm13, %v1892_v12, %v1896_v14  ;;  %v1911_v30 = vsel %vm3084_vm13, %v1906_v13, %v1910_v19  ;;  %v1874_v61 = vld [vmem:[#allocation3 + $0x28] sm:$0xf] }
  0xdb   : > { %v1927_v37 = vshrl.u32 %v1872_v15, 16  ;;  %v1930_v38 = vshll.u32 %v1872_v15, 16  ;;  %v2510_v40 = vrot.slane %v2062_v55, 9  ;;  %v2096_v41 = vrot.slane %v1871_v20, 5 }
  0xdc   : > { %v1703_v47 = vsel %vm3069_vm12, %v2472_v56, %v1702_v10  ;;  %v534_v33 = vshrl.u32 %v476_v59, 16  ;;  %v2511_v42 = vrot.slane %v2063_v34, 9  ;;  %v2100_v43 = vrot.slane %v1873_v31, 5  ;;  %v603_v56 = vld [vmem:[#allocation3 + $0x44] sm:$0x1] }
  0xdd   : > { %v1723_v27 = vunpack.c.l.b16 %v1703_v47  ;;  %v1915_v44 = vrot.slane %v1913_v24, 4  ;;  %v1918_v45 = vrot.slane %v1916_v25, 5  ;;  %v1996_v32 = vunpack.c.l.b16 %v1897_v29  ;;  %v1666_v10 = vld [vmem:[#allocation3 + $0x20] sm:$0xe]  ;;  %v1876_v25 = vld [vmem:[#allocation3 + $0x30] sm:$0xf] }
  0xde   : > { %v1997_v48 = vunpack.c.l.b16 %v1911_v30  ;;  %v1922_v39 = vshll.u32 %v1871_v20, 16  ;;  %v1929_v23 = vrot.slane %v1927_v37, 4  ;;  %v2097_v54 = vsel %vm3069_vm12, %v2510_v40, %v2096_v41 }
  0xdf   : > { %v3401_v35 = vpop.f32.mrf.mxu3  ;;  %v3403_v28 = vpack.c.b16 %v1723_v27, %v1722_v21  ;;  %v536_v57 = vrot.slane %v534_v33, 7  ;;  %v2101_v58 = vsel %vm3069_vm12, %v2511_v42, %v2100_v43  ;;  %v1919_v63 = vor.u32 %v1918_v45, %v1915_v44  ;;  %v1877_v43 = vld [vmem:[#allocation3 + $0x34] sm:$0x1]  ;;  %v2064_v44 = vld [vmem:[#allocation3 + $0x28] sm:$0xe] }
  0xe0   : > { %v3385_v1 = vpop.f32.mrf.mxu1  ;;  %v2004_v2 = vpack.c.b16 %v1997_v48, %v1996_v32  ;;  %v1936_v3 = vshll.u32 %v1873_v31, 16  ;;  %v2120_v6 = vunpack.c.l.b16 %v2097_v54  ;;  %v1924_v7 = vrot.slane %v1922_v39, 5  ;;  %v2065_v45 = vld [vmem:[#allocation3 + $0x30] sm:$0xe] }
  0xe1   : > { %v540_v4 = vrot.slane %v536_v57, 4  ;;  %v2121_v12 = vunpack.c.l.b16 %v2101_v58  ;;  %v2489_v14 = vor.u32 %v2540_v62, %v2488_v60  ;;  %v1920_v15 = vrot.slane %v1919_v63, 4 }
  0xe2   : > { %v2473_v47 = vrot.slane %v1666_v10, 9  ;;  %v1706_v21 = vrot.slane %v3301_v49, 5  ;;  %v1938_v24 = vrot.slane %v1936_v3, 5  ;;  %v1710_v27 = vrot.slane %v3313_v11, 5 }
  0xe3   : > { %2462 = vmatmul.msk.bf16.gmra.mxu2 %vm752_vm5, %v2458_v53  ;;  %v1932_v53 = vrot.slane %v1930_v38, 5  ;;  %v604_v19 = vsel %vm3022_vm7, %v540_v4, %v603_v56  ;;  %v1941_v29 = vshrl.u32 %v1874_v61, 16  ;;  %v1944_v31 = vshll.u32 %v1874_v61, 16  ;;  %v1875_v38 = vld [vmem:[#allocation3 + $0x2c] sm:$0x1] }
  0xe4   : > { %605 = vst [vmem:[#allocation3 + $0x44] sm:$0x1] %v604_v19  ;;  %v1707_v34 = vsel %vm3069_vm12, %v2473_v47, %v1706_v21  ;;  %v2127_v30 = vpack.c.b16 %v2121_v12, %v2120_v6  ;;  %v1925_v16 = vsel %vm3084_vm13, %v1920_v15, %v1924_v7  ;;  %v1955_v40 = vshrl.u32 %v1876_v25, 16  ;;  %v2541_v15 = vld [vmem:[#allocation3 + $0x2c] sm:$0xf0] }
  0xe5   : > { %v1933_v8 = vor.u32 %v1932_v53, %v1929_v23  ;;  %v1724_v37 = vunpack.c.l.b16 %v1707_v34  ;;  %v1958_v41 = vshll.u32 %v1876_v25, 16  ;;  %v1943_v32 = vrot.slane %v1941_v29, 4  ;;  %v1668_v47 = vld [vmem:[#allocation3 + $0x30] sm:$0xe]  ;;  %v1669_v21 = vld [vmem:[#allocation3 + $0x38] sm:$0xe] }
  0xe6   : > { %2428 = vmatmul.msk.bf16.gmra.mxu0 %vm752_vm5, %v1211_v0  ;;  %v537_v0 = vshll.u32 %v476_v59, 16  ;;  %v1946_v48 = vrot.slane %v1944_v31, 5  ;;  %v1998_v23 = vunpack.c.l.b16 %v1925_v16  ;;  %v2104_v58 = vrot.slane %v1875_v38, 5  ;;  %v1878_v34 = vld [vmem:[#allocation3 + $0x38] sm:$0xf] }
  0xe7   : > { %v3414_v20 = vpop.f32.mrf.mxu3  ;;  %v1934_v59 = vrot.slane %v1933_v8, 4  ;;  %v2513_v60 = vrot.slane %v2065_v45, 9  ;;  %v2108_v62 = vrot.slane %v1877_v43, 5  ;;  %v1960_v3 = vrot.slane %v1958_v41, 5  ;;  %v2066_v45 = vld [vmem:[#allocation3 + $0x38] sm:$0xe] }
  0xe8   : > { %v3406_v51 = vpop.f32.mrf.mxu1  ;;  %v539_v13 = vor.u32 %v537_v0, %v536_v57  ;;  %v2512_v57 = vrot.slane %v2064_v44, 9  ;;  %v1947_v6 = vor.u32 %v1946_v48, %v1943_v32  ;;  %v1950_v7 = vshll.u32 %v1875_v38, 16  ;;  %v1879_v44 = vld [vmem:[#allocation3 + $0x3c] sm:$0x1] }
  0xe9   : > { %2498 = vmatmul.msk.bf16.vlgmr.msra.gmra.mxu1 %vm752_vm5, %v2485_v18  ;;  %2516 = vmatmul.msk.bf16.vlgmr.msra.gmra.mxu3 %vm752_vm5, %v2126_v22  ;;  %v1667_v18 = vld [vmem:[#allocation3 + $0x28] sm:$0xe]  ;;  %v2109_v56 = vsel %vm3069_vm12, %v2513_v60, %v2108_v62  ;;  %v1964_v10 = vshll.u32 %v1877_v43, 16  ;;  %v1714_v25 = vrot.slane %v3348_v17, 5  ;;  %v1969_v41 = vshrl.u32 %v1878_v34, 16 }
  0xea   : > { %v2474_v22 = vrot.slane %v1667_v18, 9  ;;  %v601_v52 = vsel %vm2948_vm3, %v539_v13, %v600_v9  ;;  %v2492_v18 = vld [vmem:[#allocation3 + $0x28] sm:$0xf]  ;;  %v1952_v13 = vrot.slane %v1950_v7, 5  ;;  %v2514_v62 = vrot.slane %v2066_v45, 9 }
  0xeb   : > { %602 = vst [vmem:[#allocation3 + $0x40] sm:$0xf] %v601_v52  ;;  %v1718_v52 = vrot.slane %v3352_v26, 5  ;;  %v1966_v31 = vrot.slane %v1964_v10, 5 }
  0xf2   : > { %v778_v5 = vpop.f32.mrf.mxu0  ;;  %v2067_v32 = vld [vmem:[#allocation3 + $0x40] sm:$0xe] }
  0xf3   : > { %2503 = vmatmul.msk.bf16.vlgmr.msra.gmra.mxu2 %vm752_vm5, %v2004_v2  ;;  %v843_v55 = vadd.f32 %v3385_v1, %v778_v5  ;;  %v1711_v1 = vsel %vm3069_vm12, %v2474_v22, %v1710_v27  ;;  %v1957_v2 = vrot.slane %v1955_v40, 4  ;;  %v2123_v5 = vunpack.c.l.b16 %v2109_v56 }
  0xf4   : > { %v1725_v33 = vunpack.c.l.b16 %v1711_v1  ;;  %v2476_v27 = vrot.slane %v1669_v21, 9  ;;  %v2493_v1 = vor.u32 %v2541_v15, %v2492_v18  ;;  %v2542_v15 = vld [vmem:[#allocation3 + $0x3c] sm:$0xf0] }
  0xf5   : > { %v1961_v61 = vor.u32 %v1960_v3, %v1957_v2  ;;  %v2112_v3 = vrot.slane %v1879_v44, 5 }
  0xf6   : > { %2477 = vmatmul.msk.bf16.vlgmr.msra.gmra.mxu0 %vm752_vm5, %v3379_v50  ;;  %v847_v49 = vpop.f32.mrf.mxu1  ;;  %v959_v11 = vpop.f32.mrf.mxu2  ;;  %v1939_v50 = vsel %vm3084_vm13, %v1934_v59, %v1938_v24  ;;  %v3433_v39 = vpack.c.b16 %v1725_v33, %v1724_v37  ;;  %v2475_v24 = vrot.slane %v1668_v47, 9  ;;  %v1972_v33 = vshll.u32 %v1878_v34, 16 }
  0xf7   : > { %v979_v42 = vadd.f32 %v959_v11, %v843_v55  ;;  %v1999_v0 = vunpack.c.l.b16 %v1939_v50  ;;  %v1962_v29 = vrot.slane %v1961_v61, 4  ;;  %v1880_v11 = vld [vmem:[#allocation3 + $0x40] sm:$0xf] }
  0xf8   : > { %v1715_v37 = vsel %vm3069_vm12, %v2475_v24, %v1714_v25  ;;  %v1983_v48 = vshrl.u32 %v1880_v11, 16 }
  0xf9   : > { %2499 = vmatmul.msk.bf16.gmra.mxu1 %vm752_vm5, %v2489_v14  ;;  %v3436_v53 = vadd.f32 %v3401_v35, %v979_v42  ;;  %2517 = vmatmul.msk.bf16.gmra.mxu3 %vm752_vm5, %v2127_v30  ;;  %v2105_v35 = vsel %vm3069_vm12, %v2512_v57, %v2104_v58  ;;  %v2005_v14 = vpack.c.b16 %v1999_v0, %v1998_v23  ;;  %v1726_v26 = vunpack.c.l.b16 %v1715_v37 }
  0xfa   : > { %v780_v54 = vpop.f32.mrf.mxu0  ;;  %v2122_v19 = vunpack.c.l.b16 %v2105_v35  ;;  %v1967_v43 = vsel %vm3084_vm13, %v1962_v29, %v1966_v31  ;;  %v1986_v23 = vshll.u32 %v1880_v11, 16  ;;  %v1974_v0 = vrot.slane %v1972_v33, 5 }
  0xfb   : > { %v845_v63 = vadd.f32 %v3406_v51, %v780_v54  ;;  %v1948_v51 = vrot.slane %v1947_v6, 4  ;;  %v2001_v60 = vunpack.c.l.b16 %v1967_v43  ;;  %v2515_v6 = vrot.slane %v2067_v32, 9 }
  0xfc   : > { %v1047_v4 = vpop.f32.mrf.mxu3  ;;  %v1985_v35 = vrot.slane %v1983_v48, 4  ;;  %v1988_v56 = vrot.slane %v1986_v23, 5 }
  0xfd   : > { %v1953_v40 = vsel %vm3084_vm13, %v1948_v51, %v1952_v13  ;;  %v1978_v13 = vshll.u32 %v1879_v44, 16 }
  0xfe   : > { %v849_v8 = vpop.f32.mrf.mxu1  ;;  %v961_v9 = vpop.f32.mrf.mxu2  ;;  %v2000_v54 = vunpack.c.l.b16 %v1953_v40 }
  0xff   : > { %v980_v12 = vadd.f32 %v961_v9, %v845_v63  ;;  %v1971_v63 = vrot.slane %v1969_v41, 4  ;;  %v1980_v29 = vrot.slane %v1978_v13, 5 }
 0x100   : > { %v2006_v61 = vpack.c.b16 %v2001_v60, %v2000_v54 }
 0x101   : > { %v3445_v22 = vadd.f32 %v3414_v20, %v980_v12  ;;  %v1719_v20 = vsel %vm3069_vm12, %v2476_v27, %v1718_v52  ;;  %v1975_v51 = vor.u32 %v1974_v0, %v1971_v63 }
 0x102   : > { %v1727_v16 = vunpack.c.l.b16 %v1719_v20 }
 0x103   : > { %v783_v55 = vpop.f32.mrf.mxu0  ;;  %2504 = vmatmul.msk.bf16.gmra.mxu2 %vm752_vm5, %v2005_v14  ;;  %v1976_v27 = vrot.slane %v1975_v51, 4 }
 0x104   : > { %v848_v59 = vadd.f32 %v847_v49, %v783_v55  ;;  %v1049_v30 = vpop.f32.mrf.mxu3  ;;  %v2128_v49 = vpack.c.b16 %v2123_v5, %v2122_v19  ;;  %v3460_v50 = vpack.c.b16 %v1727_v16, %v1726_v26  ;;  %v1989_v19 = vor.u32 %v1988_v56, %v1985_v35  ;;  %v2496_v5 = vld [vmem:[#allocation3 + $0x38] sm:$0xf] }
 0x105   : > { %v1981_v20 = vsel %vm3084_vm13, %v1976_v27, %v1980_v29 }
 0x106   : > { %2478 = vmatmul.msk.bf16.gmra.mxu0 %vm752_vm5, %v3403_v28  ;;  %v852_v17 = vpop.f32.mrf.mxu1  ;;  %v964_v38 = vpop.f32.mrf.mxu2  ;;  %v1881_v28 = vld [vmem:[#allocation3 + $0x44] sm:$0x1]  ;;  %v1990_v36 = vrot.slane %v1989_v19, 4 }
 0x107   : > { %v981_v42 = vadd.f32 %v964_v38, %v848_v59  ;;  %v2116_v7 = vrot.slane %v1881_v28, 5  ;;  %v2497_v59 = vor.u32 %v2542_v15, %v2496_v5  ;;  %v2002_v38 = vunpack.c.l.b16 %v1981_v20 }
 0x109   : > { %2500 = vmatmul.msk.bf16.gmra.mxu1 %vm752_vm5, %v2493_v1  ;;  %v3463_v57 = vadd.f32 %v1047_v4, %v981_v42  ;;  %2518 = vmatmul.msk.bf16.gmra.mxu3 %vm752_vm5, %v2128_v49  ;;  %v2113_v4 = vsel %vm3069_vm12, %v2514_v62, %v2112_v3  ;;  %v2117_v18 = vsel %vm3069_vm12, %v2515_v6, %v2116_v7 }
 0x10a   : > { %v2124_v55 = vunpack.c.l.b16 %v2113_v4  ;;  %v2125_v24 = vunpack.c.l.b16 %v2117_v18 }
 0x10b   : > { %v785_v58 = vpop.f32.mrf.mxu0 }
 0x10c   : > { %v850_v2 = vadd.f32 %v849_v8, %v785_v58  ;;  %v1052_v9 = vpop.f32.mrf.mxu3  ;;  %v1992_v8 = vshll.u32 %v1881_v28, 16  ;;  %v2129_v37 = vpack.c.b16 %v2125_v24, %v2124_v55 }
 0x10e   : > { %v854_v12 = vpop.f32.mrf.mxu1  ;;  %v966_v14 = vpop.f32.mrf.mxu2  ;;  %v1994_v31 = vrot.slane %v1992_v8, 5 }
 0x10f   : > { %v982_v10 = vadd.f32 %v966_v14, %v850_v2 }
 0x111   : > { %v3470_v47 = vadd.f32 %v1049_v30, %v982_v10 }
 0x113   : > { %v788_v21 = vpop.f32.mrf.mxu0  ;;  %2505 = vmatmul.msk.bf16.gmra.mxu2 %vm752_vm5, %v2006_v61 }
 0x114   : > { %v853_v25 = vadd.f32 %v852_v17, %v788_v21  ;;  %v1054_v52 = vpop.f32.mrf.mxu3  ;;  %v1995_v17 = vsel %vm3084_vm13, %v1990_v36, %v1994_v31 }
 0x116   : > { %2479 = vmatmul.msk.bf16.gmra.mxu0 %vm752_vm5, %v3433_v39  ;;  %v857_v34 = vpop.f32.mrf.mxu1  ;;  %v969_v1 = vpop.f32.mrf.mxu2  ;;  %v2003_v39 = vunpack.c.l.b16 %v1995_v17 }
 0x117   : > { %v983_v30 = vadd.f32 %v969_v1, %v853_v25 }
 0x118   : > { %v2007_v42 = vpack.c.b16 %v2003_v39, %v2002_v38 }
 0x119   : > { %2501 = vmatmul.msk.bf16.gmra.mxu1 %vm752_vm5, %v2497_v59  ;;  %v3480_v11 = vadd.f32 %v1052_v9, %v983_v30  ;;  %2519 = vmatmul.msk.bf16.gmra.mxu3 %vm752_vm5, %v2129_v37 }
 0x11b   : > { %v790_v26 = vpop.f32.mrf.mxu0 }
 0x11c   : > { %v855_v16 = vadd.f32 %v854_v12, %v790_v26  ;;  %v1057_v49 = vpop.f32.mrf.mxu3 }
 0x11e   : > { %v859_v40 = vpop.f32.mrf.mxu1  ;;  %v971_v41 = vpop.f32.mrf.mxu2 }
 0x11f   : > { %v984_v33 = vadd.f32 %v971_v41, %v855_v16 }
 0x121   : > { %v3483_v43 = vadd.f32 %v1054_v52, %v984_v33 }
 0x123   : > { %v793_v44 = vpop.f32.mrf.mxu0  ;;  %2506 = vmatmul.msk.bf16.gmra.mxu2 %vm752_vm5, %v2007_v42 }
 0x124   : > { %v858_v46 = vadd.f32 %v857_v34, %v793_v44  ;;  %v1059_v45 = vpop.f32.mrf.mxu3 }
 0x126   : > { %2480 = vmatmul.msk.bf16.gmra.mxu0 %vm752_vm5, %v3460_v50  ;;  %v1358_v28 = vpop.f32.mrf.mxu1  ;;  %v974_v32 = vpop.f32.mrf.mxu2 }
 0x127   : > { %v985_v48 = vadd.f32 %v974_v32, %v858_v46 }
 0x129   : > { %v3488_v23 = vadd.f32 %v1057_v49, %v985_v48 }
 0x12b   : > { %v795_v54 = vpop.f32.mrf.mxu0 }
 0x12c   : > { %v860_v58 = vadd.f32 %v859_v40, %v795_v54  ;;  %v1634_v60 = vpop.f32.mrf.mxu3 }
 0x12e   : > { %v1360_v62 = vpop.f32.mrf.mxu1  ;;  %v976_v63 = vpop.f32.mrf.mxu2 }
 0x12f   : > { %v986_v0 = vadd.f32 %v976_v63, %v860_v58 }
 0x131   : > { %v3490_v2 = vadd.f32 %v1059_v45, %v986_v0 }
 0x133   : > { %v1236_v3 = vpop.f32.mrf.mxu0 }
 0x134   : > { %v1636_v6 = vpop.f32.mrf.mxu3  ;;  %v1256_v59 = vadd.f32 %v1236_v3, %v3436_v53 }
 0x136   : > { %v1363_v7 = vpop.f32.mrf.mxu1  ;;  %v1440_v9 = vpop.f32.mrf.mxu2  ;;  %v1378_v34 = vadd.f32 %v1358_v28, %v1256_v59  ;;  %v3537_v28 = vld [vmem:[%s3634_s4] ss:$0 sm:$0xff] }
 0x138   : > { %v1460_v37 = vadd.f32 %v1440_v9, %v1378_v34 }
 0x13a   : > { %v1654_v38 = vadd.f32 %v1634_v60, %v1460_v37 }
 0x13b   : > { %v1238_v35 = vpop.f32.mrf.mxu0 }
 0x13c   : > { %v3492_v56 = vpop.f32.mrf.mxu3  ;;  %v1257_v30 = vadd.f32 %v1238_v35, %v3445_v22  ;;  %v3532_v22 = vld [vmem:[%s3633_s3] ss:$0 sm:$0xff] }
 0x13e   : > { %v1365_v50 = vpop.f32.mrf.mxu1  ;;  %v1442_v12 = vpop.f32.mrf.mxu2  ;;  %v1379_v16 = vadd.f32 %v1360_v62, %v1257_v30 }
 0x140   : > { %v1461_v53 = vadd.f32 %v1442_v12, %v1379_v16 }
 0x142   : > { %v1655_v32 = vadd.f32 %v1636_v6, %v1461_v53 }
 0x143   : > { %v1241_v14 = vpop.f32.mrf.mxu0 }
 0x144   : > { %v3494_v61 = vpop.f32.mrf.mxu3  ;;  %v1258_v40 = vadd.f32 %v1241_v14, %v3463_v57 }
 0x146   : > { %v3496_v10 = vpop.f32.mrf.mxu1  ;;  %v1445_v4 = vpop.f32.mrf.mxu2  ;;  %v1380_v46 = vadd.f32 %v1363_v7, %v1258_v40 }
 0x148   : > { %v1462_v60 = vadd.f32 %v1445_v4, %v1380_v46 }
 0x14a   : > { %v1656_v59 = vadd.f32 %v3492_v56, %v1462_v60 }
 0x14b   : > { %v1243_v18 = vpop.f32.mrf.mxu0 }
 0x14c   : > { %v3498_v51 = vpop.f32.mrf.mxu3  ;;  %v1259_v62 = vadd.f32 %v1243_v18, %v3470_v47 }
 0x14e   : > { %v3500_v13 = vpop.f32.mrf.mxu1  ;;  %v1447_v19 = vpop.f32.mrf.mxu2  ;;  %v1381_v12 = vadd.f32 %v1365_v50, %v1259_v62 }
 0x150   : > { %v1463_v34 = vadd.f32 %v1447_v19, %v1381_v12 }
 0x152   : > { %v1657_v53 = vadd.f32 %v3494_v61, %v1463_v34 }
 0x153   : > { %v1246_v8 = vpop.f32.mrf.mxu0 }
 0x154   : > { %v3502_v5 = vpop.f32.mrf.mxu3  ;;  %v1260_v37 = vadd.f32 %v1246_v8, %v3480_v11 }
 0x156   : > { %v3504_v15 = vpop.f32.mrf.mxu1  ;;  %v3506_v21 = vpop.f32.mrf.mxu2 }
 0x15b   : > { %v3508_v55 = vpop.f32.mrf.mxu0 }
 0x15c   : > { %v3510_v24 = vpop.f32.mrf.mxu3 }
 0x15e   : > { %v3512_v25 = vpop.f32.mrf.mxu1  ;;  %v3514_v27 = vpop.f32.mrf.mxu2 }
 0x163   : > { %v3516_v52 = vpop.f32.mrf.mxu0 }
 0x164   : > { %v3519_v29 = vpop.f32.mrf.mxu3  ;;  %v1262_v60 = vadd.f32 %v3516_v52, %v3488_v23 }
 0x166   : > { %v3521_v36 = vpop.f32.mrf.mxu2  ;;  %v1838_v31 = vpop.f32.mrf.mxu1 }
 0x16b   : > { %v3523_v1 = vpop.f32.mrf.mxu0 }
 0x16c   : > { %v2154_v20 = vpop.f32.mrf.mxu3 }
 0x16e   : > { %v3526_v17 = vpop.f32.mrf.mxu2  ;;  %v1840_v26 = vpop.f32.mrf.mxu1 }
 0x173   : > { %v1756_v39 = vpop.f32.mrf.mxu0 }
 0x174   : > { %v1776_v49 = vadd.f32 %v1756_v39, %v1654_v38  ;;  %v2156_v33 = vpop.f32.mrf.mxu3  ;;  %v1382_v38 = vadd.f32 %v3496_v10, %v1260_v37 }
 0x176   : > { %v1858_v41 = vadd.f32 %v1838_v31, %v1776_v49  ;;  %v2032_v42 = vpop.f32.mrf.mxu2  ;;  %v1843_v54 = vpop.f32.mrf.mxu1  ;;  %v1464_v8 = vadd.f32 %v3506_v21, %v1382_v38 }
 0x178   : > { %v2052_v44 = vadd.f32 %v2032_v42, %v1858_v41  ;;  %v1261_v41 = vadd.f32 %v3508_v55, %v3483_v43 }
 0x17a   : > { %v2174_v45 = vadd.f32 %v2154_v20, %v2052_v44 }
 0x17b   : > { %v1758_v48 = vpop.f32.mrf.mxu0 }
 0x17c   : > { %v2186_v57 = vmul.f32 %v3532_v22, %v2174_v45  ;;  %v1777_v58 = vadd.f32 %v1758_v48, %v1655_v32  ;;  %v2159_v7 = vpop.f32.mrf.mxu3  ;;  %v1383_v45 = vadd.f32 %v3500_v13, %v1261_v41 }
 0x17e   : > { %v2198_v63 = vadd.f32 %v3537_v28, %v2186_v57  ;;  %v1859_v0 = vadd.f32 %v1840_v26, %v1777_v58  ;;  %v2034_v3 = vpop.f32.mrf.mxu2  ;;  %v1845_v31 = vpop.f32.mrf.mxu1  ;;  %v1465_v58 = vadd.f32 %v3514_v27, %v1383_v45 }
 0x180   : > { %vm2206_vm14 = vcmp.ge.f32.partialorder %v2198_v63, 0.0  ;;  %v2214_v9 = vmul.f32 0.01, %v2198_v63  ;;  %v2053_v35 = vadd.f32 %v2034_v3, %v1859_v0  ;;  %v1659_v12 = vadd.f32 %v3502_v5, %v1465_v58 }
 0x182   : > { %v2222_v14 = vsel %vm2206_vm14, %v2198_v63, %v2214_v9  ;;  %v2175_v6 = vadd.f32 %v2156_v33, %v2053_v35 }
 0x183   : > { %2230 = vst.msk [vmem:[%s3544_s23] sm:$0xff] %vm752_vm5, %v2222_v14  ;;  %v1761_v4 = vpop.f32.mrf.mxu0 }
 0x184   : > { %v2187_v47 = vmul.f32 %v3532_v22, %v2175_v6  ;;  %v1778_v18 = vadd.f32 %v1761_v4, %v1656_v59  ;;  %v2161_v16 = vpop.f32.mrf.mxu3  ;;  %v1263_v59 = vadd.f32 %v3523_v1, %v3490_v2 }
 0x186   : > { %v2199_v50 = vadd.f32 %v3537_v28, %v2187_v47  ;;  %v1860_v30 = vadd.f32 %v1843_v54, %v1778_v18  ;;  %v2037_v20 = vpop.f32.mrf.mxu2  ;;  %v1848_v44 = vpop.f32.mrf.mxu1  ;;  %v1658_v54 = vadd.f32 %v3498_v51, %v1464_v8 }
 0x188   : > { %vm2207_vm15 = vcmp.ge.f32.partialorder %v2199_v50, 0.0  ;;  %v2215_v56 = vmul.f32 0.01, %v2199_v50  ;;  %v2054_v26 = vadd.f32 %v2037_v20, %v1860_v30 }
 0x18a   : > { %v2223_v39 = vsel %vm2207_vm15, %v2199_v50, %v2215_v56  ;;  %v2176_v49 = vadd.f32 %v2159_v7, %v2054_v26  ;;  %v1384_v7 = vadd.f32 %v3504_v15, %v1262_v60 }
 0x18b   : > { %2231 = vst.msk [vmem:[%s3544_s23 + $0x8] sm:$0xff] %vm752_vm5, %v2223_v39  ;;  %v1763_v40 = vpop.f32.mrf.mxu0 }
 0x18c   : > { %v2188_v11 = vmul.f32 %v3532_v22, %v2176_v49  ;;  %v1779_v19 = vadd.f32 %v1763_v40, %v1657_v53  ;;  %v2164_v21 = vpop.f32.mrf.mxu3  ;;  %v1466_v6 = vadd.f32 %v3521_v36, %v1384_v7 }
 0x18e   : > { %v2200_v33 = vadd.f32 %v3537_v28, %v2188_v11  ;;  %v1861_v42 = vadd.f32 %v1845_v31, %v1779_v19  ;;  %v2039_v10 = vpop.f32.mrf.mxu2  ;;  %v1850_v3 = vpop.f32.mrf.mxu1  ;;  %v1385_v31 = vadd.f32 %v3512_v25, %v1263_v59  ;;  %v1660_v50 = vadd.f32 %v3510_v24, %v1466_v6 }
 0x190   : > { %vm2208_vm0 = vcmp.ge.f32.partialorder %v2200_v33, 0.0  ;;  %v2216_v46 = vmul.f32 0.01, %v2200_v33  ;;  %v2055_v61 = vadd.f32 %v2039_v10, %v1861_v42  ;;  %v1467_v20 = vadd.f32 %v3526_v17, %v1385_v31 }
 0x192   : > { %v2224_v32 = vsel %vm2208_vm0, %v2200_v33, %v2216_v46  ;;  %v2177_v48 = vadd.f32 %v2161_v16, %v2055_v61  ;;  %v1661_v53 = vadd.f32 %v3519_v29, %v1467_v20 }
 0x193   : > { %2232 = vst.msk [vmem:[%s3544_s23 + $0x10] sm:$0xff] %vm752_vm5, %v2224_v32  ;;  %v1766_v57 = vpop.f32.mrf.mxu0 }
 0x194   : > { %v2189_v43 = vmul.f32 %v3532_v22, %v2177_v48  ;;  %v1780_v55 = vadd.f32 %v1766_v57, %v1658_v54  ;;  %v2166_v14 = vpop.f32.mrf.mxu3 }
 0x196   : > { %v2201_v62 = vadd.f32 %v3537_v28, %v2189_v43  ;;  %v1862_v13 = vadd.f32 %v1848_v44, %v1780_v55  ;;  %v2042_v63 = vpop.f32.mrf.mxu2  ;;  %v1853_v36 = vpop.f32.mrf.mxu1 }
 0x198   : > { %vm2209_vm1 = vcmp.ge.f32.partialorder %v2201_v62, 0.0  ;;  %v2217_v0 = vmul.f32 0.01, %v2201_v62  ;;  %v2056_v51 = vadd.f32 %v2042_v63, %v1862_v13 }
 0x19a   : > { %v2225_v9 = vsel %vm2209_vm1, %v2201_v62, %v2217_v0  ;;  %v2178_v35 = vadd.f32 %v2164_v21, %v2056_v51 }
 0x19b   : > { %2233 = vst.msk [vmem:[%s3544_s23 + $0x18] sm:$0xff] %vm752_vm5, %v2225_v9  ;;  %v1768_v27 = vpop.f32.mrf.mxu0 }
 0x19c   : > { %v2190_v23 = vmul.f32 %v3532_v22, %v2178_v35  ;;  %v1781_v52 = vadd.f32 %v1768_v27, %v1659_v12  ;;  %v2169_v16 = vpop.f32.mrf.mxu3 }
 0x19e   : > { %v2202_v4 = vadd.f32 %v3537_v28, %v2190_v23  ;;  %v1863_v15 = vadd.f32 %v1850_v3, %v1781_v52  ;;  %v2044_v47 = vpop.f32.mrf.mxu2  ;;  %v1855_v19 = vpop.f32.mrf.mxu1 }
 0x1a0   : > { %vm2210_vm2 = vcmp.ge.f32.partialorder %v2202_v4, 0.0  ;;  %v2218_v18 = vmul.f32 0.01, %v2202_v4  ;;  %v2057_v5 = vadd.f32 %v2044_v47, %v1863_v15 }
 0x1a2   : > { %v2226_v34 = vsel %vm2210_vm2, %v2202_v4, %v2218_v18  ;;  %v2179_v37 = vadd.f32 %v2166_v14, %v2057_v5 }
 0x1a3   : > { %2234 = vst.msk [vmem:[%s3544_s23 + $0x20] sm:$0xff] %vm752_vm5, %v2226_v34  ;;  %v1771_v30 = vpop.f32.mrf.mxu0 }
 0x1a4   : > { %v2191_v2 = vmul.f32 %v3532_v22, %v2179_v37  ;;  %v1782_v1 = vadd.f32 %v1771_v30, %v1660_v50  ;;  %v2171_v29 = vpop.f32.mrf.mxu3 }
 0x1a6   : > { %v2203_v56 = vadd.f32 %v3537_v28, %v2191_v2  ;;  %v1864_v26 = vadd.f32 %v1853_v36, %v1782_v1  ;;  %v2047_v25 = vpop.f32.mrf.mxu2 }
 0x1a8   : > { %vm2211_vm3 = vcmp.ge.f32.partialorder %v2203_v56, 0.0  ;;  %v2219_v38 = vmul.f32 0.01, %v2203_v56  ;;  %v2058_v39 = vadd.f32 %v2047_v25, %v1864_v26 }
 0x1aa   : > { %v2227_v24 = vsel %vm2211_vm3, %v2203_v56, %v2219_v38  ;;  %v2180_v49 = vadd.f32 %v2169_v16, %v2058_v39 }
 0x1ab   : > { %2235 = vst.msk [vmem:[%s3544_s23 + $0x28] sm:$0xff] %vm752_vm5, %v2227_v24  ;;  %v1773_v40 = vpop.f32.mrf.mxu0 }
 0x1ac   : > { %v2192_v11 = vmul.f32 %v3532_v22, %v2180_v49  ;;  %v1783_v17 = vadd.f32 %v1773_v40, %v1661_v53 }
 0x1ae   : > { %v2204_v8 = vadd.f32 %v3537_v28, %v2192_v11  ;;  %v1865_v41 = vadd.f32 %v1855_v19, %v1783_v17  ;;  %v2049_v33 = vpop.f32.mrf.mxu2 }
 0x1b0   : > { %vm2212_vm4 = vcmp.ge.f32.partialorder %v2204_v8, 0.0  ;;  %v2220_v42 = vmul.f32 0.01, %v2204_v8  ;;  %v2059_v10 = vadd.f32 %v2049_v33, %v1865_v41 }
 0x1b2   : > { %v2228_v44 = vsel %vm2212_vm4, %v2204_v8, %v2220_v42  ;;  %v2181_v46 = vadd.f32 %v2171_v29, %v2059_v10 }
 0x1b3   : > { %2236 = vst.msk [vmem:[%s3544_s23 + $0x30] sm:$0xff] %vm752_vm5, %v2228_v44 }
 0x1b4   : > { %v2193_v61 = vmul.f32 %v3532_v22, %v2181_v46 }
 0x1b6   : > { %v2205_v45 = vadd.f32 %v3537_v28, %v2193_v61 }
 0x1b8   : > { %vm2213_vm6 = vcmp.ge.f32.partialorder %v2205_v45, 0.0  ;;  %v2221_v32 = vmul.f32 0.01, %v2205_v45 }
 0x1ba   : > { %v2229_v48 = vsel %vm2213_vm6, %v2205_v45, %v2221_v32 }
 0x1bb   : > { %2237 = vst.msk [vmem:[%s3544_s23 + $0x38] sm:$0xff] %vm752_vm5, %v2229_v48 }
 0x1bc   : > { %2690 = shalt.err (!%p2687_p7)
}
 0x1bd   : > { %s2739_s0 = smov 128   ;;  %s2740_s24 = smov 8  }
 0x1be   : > { %2548 = dma.vmem_to_hbm [thread:$0]  (%p2821_p11), %s2252_s7, 1024, %s2254_s11, %s2239_s22, %s2739_s0, %s2739_s0, %s2740_s24  }
 0x1bf PF: > { %s2268_s12 = sand.u32 1, %s2721_s18   ;;  %p2558_p0 = pnand %p2354_p9, %p2825_p12 }
 0x1c0   : > { %s2269_s13 = scalar_lea.sflag [#allocation6], %s2268_s12 }
 0x1c1   : > { %p2559_p8 = pneg %p2558_p0 }
 0x1c3   : > { %2716 = dma.done.wait (%p2559_p8), %s2269_s13, 1024  }
 0x1c4   : > { %2718 = vsyncadd (%p2559_p8), %s2269_s13, 4294966272  ;;  %s3662_s21 = sld [smem:[#allocation14_spill]]  ;;  %s3665_s18 = smov %s2725_s19 }
 0x1c5   : > { %s3663_s15 = sld [smem:[#allocation13_spill]] }
 0x1c6   : > { %s3664_s20 = sld [smem:[#allocation15_spill]] }
 0x1ca   : > { %p21_p10 = scmp.ge.s32.totalorder %s3662_s21, 4  }
 0x1cb   : > { %s3666_s19 = smov %s3663_s15 }
 0x1cc   :  { %23 = sbr.rel (!%p21_p10) target bundleno = 9 (0x9), region = 111 }
 0x1d1   :  { %2275 = vsyncpa [#allocation5], 1 }
 0x1d2   :  { %2277 = vsyncpa [#allocation5 + $0x1], 1 }
 0x1d3   :  { %2278 = vsyncpa [#allocation8], 1 }
 0x1d4   :  { %2280 = vsyncpa [#allocation8 + $0x1], 1 }
 0x1d5   :  { %2281 = vsyncpa [#allocation6], 1 }
 0x1d6   :  { %2283 = vsyncpa [#allocation6 + $0x1], 1 }

</bundles_post_ra>
